<compile_context>
chip_gen: v7x
topology: tpu7x:2x2x1
jax: 0.10.0
libtpu: 0.0.40
codegen_flags: <defaults>
</compile_context>

<pallas_src>
import math
import functools

import jax
import jax.numpy as jnp
from jax.experimental import pallas as pl
from jax.experimental.pallas import tpu as pltpu


def _ge_attention_kernel(
    x_head_ref, x_tail_ref, w_ref, b_ref, adj_ref,      # inputs
    out_ref, *fr_refs,                                   # outputs (fr optional)
    n_heads, d_head, batch_block, lane_dense,
):
    """One grid step == `batch_block` (<= 8) batch elements, statically unrolled.

    w_ref = [W_head*rel, W_head, W_v, W_out]   (4, D, D)
    b_ref = [b_head*rel, b_head, b_v, b_out]   (4, 1, D)
    adj_ref = additive topology mask           (H, N, N)   values in {0, -1e4}

    Per batch element:
        F_head = x_head @ (W_head*rel) + b_head*rel        # rel_emb pre-folded
        F_tail = x_tail @  W_head      + b_head             # sym_weight=True
        F_v    = x_tail @  W_v         + b_v
      per head h (static loop, dh-wide static lane slices of F_*):
        S_h = F_head_h @ F_tail_h^T / sqrt(dh) + adj_mask_h
        P_h = softmax(S_h)
        out += (P_h @ F_v_h) @ W_out[h*dh:(h+1)*dh, :]
    """
    H, dh = n_heads, d_head
    N = x_head_ref.shape[1]
    D = x_head_ref.shape[2]
    inv_sqrt = jnp.float32(1.0 / math.sqrt(dh))
    fr_ref = fr_refs[0] if fr_refs else None

    # Invariant loads, hoisted once per grid step (not re-issued per unrolled iter).
    w_head_rel, w_tail, w_v, w_out = (w_ref[k] for k in range(4))
    b_head_rel, b_tail, b_v, b_out = (b_ref[k] for k in range(4))
    w_out_blk = [w_out[h * dh:(h + 1) * dh, :] for h in range(H)]   # (dh, D) row blocks
    adj = [adj_ref[h] for h in range(H)]                            # (N, N) per head

    for b in range(batch_block):            # bounded (<= 8) static unroll
        xh = x_head_ref[b]                  # (N, D)
        xt = x_tail_ref[b]                  # (N, D)

        # Head-batched projections: 3 full-width MXU pushes instead of 3*H narrow ones.
        f_head = jnp.dot(xh, w_head_rel, preferred_element_type=jnp.float32) + b_head_rel
        f_tail = jnp.dot(xt, w_tail, preferred_element_type=jnp.float32) + b_tail
        f_v = jnp.dot(xt, w_v, preferred_element_type=jnp.float32) + b_v

        acc = jnp.zeros((N, D), jnp.float32)
        fr_heads = []
        for h in range(H):                  # static head loop
            sl = slice(h * dh, (h + 1) * dh)
            # f_head_h @ f_tail_h^T (contract last dims, no explicit transpose op).
            s = jax.lax.dot_general(
                f_head[:, sl], f_tail[:, sl], (((1,), (1,)), ((), ())),
                preferred_element_type=jnp.float32) * inv_sqrt + adj[h]
            m = jnp.max(s, axis=-1, keepdims=True)
            e = jnp.exp(s - m)
            # Exact reciprocal: fr_graph is an emitted output, keep rows summing to 1.
            p = e * pl.reciprocal(jnp.sum(e, axis=-1, keepdims=True))
            if fr_ref is not None:
                fr_heads.append(p)
            head_out = jnp.dot(p, f_v[:, sl], preferred_element_type=jnp.float32)
            acc = acc + jnp.dot(head_out, w_out_blk[h],
                                preferred_element_type=jnp.float32)
        out = acc + b_out                                           # (N, D)

        if lane_dense:
            # One full-width (1, N*D) / (1, H*N*N) row store per batch element
            # instead of masked narrow stores into 32-/8-lane-wide blocks.
            out_ref[pl.ds(b, 1), :] = out.reshape(1, -1)
            if fr_ref is not None:
                fr_ref[pl.ds(b, 1), :] = jnp.stack(fr_heads, axis=0).reshape(1, -1)
        else:
            out_ref[b] = out
            if fr_ref is not None:
                fr_ref[b] = jnp.stack(fr_heads, axis=0)


def _build_topology_mask(params, N):
    """Parameter-only FR-Graph topology as an additive mask (0 / -1e4), computed in
    the wrapper.  sigmoid(s + bias) > 0.5  <=>  s + bias > 0, and the NSI /
    readout-pruning multiplicative masks zero entries that then never pass 0.5."""
    def _l2norm(w):
        return w / jnp.maximum(jnp.linalg.norm(w, axis=-1, keepdims=True), 1e-12)

    top_score = jnp.einsum("hnc,hmc->hnm", _l2norm(params["col_head"]),
                           _l2norm(params["col_tail"]))
    keep = (top_score + params["topo_bias"]) > 0.0
    keep = keep & (~jnp.eye(N, dtype=bool))[None, :, :]       # nsi: no self-interaction
    keep = keep & (jnp.arange(N) != 0)[None, None, :]         # prune edges to readout node
    # TODO(synk): forward value of the straight-through estimator only; gradients
    # through the hard topology threshold are not implemented (forward-only kernel).
    return jnp.where(keep, 0.0, -10000.0).astype(jnp.float32)


def _choose_schedule(batch_size):
    """batch_block capped at 8: amortizes the ~0.35 us per-grid-step overhead without
    unbounded unroll or unbounded double-buffered output blocks in scoped VMEM.
    On multi-TensorCore chips (v7x) the batch axis is marked CORE_PARALLEL."""
    kind = ""
    try:
        kind = jax.devices()[0].device_kind.lower()
    except Exception:
        pass
    sem = "parallel"
    if "v7" in kind:                                    # 2 TensorCores per chip
        sem = getattr(pltpu, "CORE_PARALLEL", "parallel")
    bb = batch_size if batch_size <= 8 else 8
    return sem, bb


def multihead_ge_attention(x_head, x_tail, params, *, n_heads,
                           batch_block=None, emit_fr_graph=True,
                           lane_dense_outputs=True):
    """Forward pass of MultiheadGEAttention (sym_weight=True, sym_topology=False,
    nsi=True, dropout=0, no key/value compression).

    Returns (out (B, N, D), fr_graph (B, H, N, N) or None)."""
    B, N, D = x_head.shape
    H = n_heads
    dh = D // H

    adj_mask = _build_topology_mask(params, N)                           # (H, N, N)

    # Fold rel_emb into the head projection: (x@W + b)*rel == x@(W*rel) + b*rel.
    rel_flat = params["rel_emb"].reshape(D)          # head-major column order matches W
    w_head = params["w_head"]
    b_head = params["b_head"]
    weights = jnp.stack([w_head * rel_flat[None, :], w_head,
                         params["w_v"], params["w_out"]], axis=0)        # (4, D, D)
    biases = jnp.stack([b_head * rel_flat, b_head,
                        params["b_v"], params["b_out"]], axis=0).reshape(4, 1, D)

    sem, bb = _choose_schedule(B)
    if batch_block is not None:
        bb = batch_block
    Bp = pl.cdiv(B, bb) * bb
    if Bp != B:                                       # pad batch to the grid
        pad = ((0, Bp - B), (0, 0), (0, 0))
        x_head = jnp.pad(x_head, pad)
        x_tail = jnp.pad(x_tail, pad)
    grid = (Bp // bb,)

    kernel = functools.partial(_ge_attention_kernel, n_heads=H, d_head=dh,
                               batch_block=bb, lane_dense=lane_dense_outputs)

    x_spec = pl.BlockSpec((bb, N, D), lambda i: (i, 0, 0))

    def _const(shape):
        return pl.BlockSpec(shape, lambda i: (0,) * len(shape))

    if lane_dense_outputs:
        out_shapes = [jax.ShapeDtypeStruct((Bp, N * D), jnp.float32)]
        out_specs = [pl.BlockSpec((bb, N * D), lambda i: (i, 0))]
        if emit_fr_graph:
            out_shapes.append(jax.ShapeDtypeStruct((Bp, H * N * N), jnp.float32))
            out_specs.append(pl.BlockSpec((bb, H * N * N), lambda i: (i, 0)))
    else:
        out_shapes = [jax.ShapeDtypeStruct((Bp, N, D), jnp.float32)]
        out_specs = [pl.BlockSpec((bb, N, D), lambda i: (i, 0, 0))]
        if emit_fr_graph:
            out_shapes.append(jax.ShapeDtypeStruct((Bp, H, N, N), jnp.float32))
            out_specs.append(pl.BlockSpec((bb, H, N, N), lambda i: (i, 0, 0, 0)))

    results = pl.pallas_call(
        kernel,
        out_shape=tuple(out_shapes),
        grid=grid,
        in_specs=[x_spec, x_spec,
                  _const((4, D, D)),      # stacked weights (single DMA descriptor)
                  _const((4, 1, D)),      # stacked biases
                  _const((H, N, N))],     # precomputed additive topology mask
        out_specs=tuple(out_specs),
        compiler_params=pltpu.CompilerParams(dimension_semantics=(sem,)),
    )(x_head, x_tail, weights, biases, adj_mask)

    out = results[0][:B].reshape(B, N, D)
    fr = results[1][:B].reshape(B, H, N, N) if emit_fr_graph else None
    return out, fr


def reference_forward(x_head, x_tail, params, *, n_heads):
    """Pure-JAX reference mirroring the PyTorch forward (for validation)."""
    B, N, D = x_head.shape
    H = n_heads
    dh = D // H

    f_head = x_head @ params["w_head"] + params["b_head"]
    f_tail = x_tail @ params["w_head"] + params["b_head"]
    f_v = x_tail @ params["w_v"] + params["b_v"]

    def _reshape(t):
        return t.reshape(B, N, H, dh).transpose(0, 2, 1, 3)

    fh, ft, fv = _reshape(f_head), _reshape(f_tail), _reshape(f_v)
    rel = params["rel_emb"]                       # (H, dh)
    weight_score = jnp.einsum("bhnd,hd,bhmd->bhnm", fh, rel, ft) / math.sqrt(dh)

    def _norm(w):
        return w / jnp.maximum(jnp.linalg.norm(w, axis=-1, keepdims=True), 1e-12)

    top_score = jnp.einsum("hnc,hmc->hnm", _norm(params["col_head"]),
                           _norm(params["col_tail"]))
    adj_probs = jax.nn.sigmoid(top_score + params["topo_bias"])
    adj_probs = adj_probs * (1.0 - jnp.eye(N))                 # nsi
    adj_probs = adj_probs * jnp.ones((N,)).at[0].set(0.0)      # prune readout
    adj = (adj_probs > 0.5).astype(jnp.float32)
    adj_mask = (1.0 - adj) * (-10000.0)

    fr = jax.nn.softmax(weight_score + adj_mask[None], axis=-1)
    x = jnp.einsum("bhnm,bhmd->bhnd", fr, fv)
    x = x.transpose(0, 2, 1, 3).reshape(B, N, D)
    x = x @ params["w_out"] + params["b_out"]
    return x, fr


if __name__ == "__main__":
    # Module config: d=32, n_heads=4, dropout=0, n=7 -> n_cols=8 tokens.
    B, n, d, H = 2, 7, 32, 4
    N = n + 1
    d_col = math.ceil(2 * math.log2(N))          # 6

    key = jax.random.PRNGKey(0)
    ks = jax.random.split(key, 8)
    kb = jax.random.split(ks[7], 3)

    x_head = jax.random.normal(ks[0], (B, N, d), dtype=jnp.float32)
    x_tail = jax.random.normal(ks[1], (B, N, d), dtype=jnp.float32)

    # Deterministic synthetic parameters (shapes from the module's __init__).
    params = {
        "w_head": jax.random.normal(ks[2], (d, d), jnp.float32) / math.sqrt(d),
        "b_head": 0.1 * jax.random.normal(kb[0], (d,), jnp.float32),
        "w_v": jax.random.normal(ks[3], (d, d), jnp.float32) / math.sqrt(d),
        "b_v": 0.1 * jax.random.normal(kb[1], (d,), jnp.float32),
        "rel_emb": jnp.ones((H, d // H), jnp.float32),
        # positive init keeps topology scores away from the threshold boundary
        "col_head": jax.random.uniform(ks[4], (H, N, d_col), jnp.float32, 0.1, 1.0),
        "col_tail": jax.random.uniform(ks[5], (H, N, d_col), jnp.float32, 0.1, 1.0),
        "topo_bias": jnp.zeros((), jnp.float32),
        "w_out": jax.random.normal(ks[6], (d, d), jnp.float32) / math.sqrt(d),
        "b_out": 0.1 * jax.random.normal(kb[2], (d,), jnp.float32),
    }

    run = functools.partial(multihead_ge_attention, x_head, x_tail, params, n_heads=H)

    try:
        out, fr_graph = run(lane_dense_outputs=True)
        jax.block_until_ready((out, fr_graph))
        lane_dense = True
    except Exception:
        # Fallback: natural (B,N,D)/(B,H,N,N) block layouts if this toolchain cannot
        # lower the in-kernel flatten relayout used by the lane-dense store path.
        out, fr_graph = run(lane_dense_outputs=False)
        jax.block_until_ready((out, fr_graph))
        lane_dense = False

    out_ref, fr_ref = reference_forward(x_head, x_tail, params, n_heads=H)
    assert out.shape == (B, N, d) and fr_graph.shape == (B, H, N, N)
    assert jnp.allclose(out, out_ref, atol=5e-3, rtol=5e-3), "output mismatch"
    assert jnp.allclose(fr_graph, fr_ref, atol=5e-3, rtol=5e-3), "fr_graph mismatch"

    # Exercise the cheaper path that skips FR-Graph emission entirely.
    out2, fr2 = run(emit_fr_graph=False, lane_dense_outputs=lane_dense)
    jax.block_until_ready(out2)
    assert fr2 is None
    assert jnp.allclose(out2, out_ref, atol=5e-3, rtol=5e-3), "output mismatch (no fr)"

    print("KERNEL_OK")
</pallas_src>

<mosaic_0001>
module attributes {stable_mosaic.version = 11 : i64} {
  func.func @_ge_attention_kernel(%arg0: i32, %arg1: memref<2x8x32xf32, #tpu.memory_space<vmem>>, %arg2: memref<2x8x32xf32, #tpu.memory_space<vmem>>, %arg3: memref<4x32x32xf32, #tpu.memory_space<vmem>>, %arg4: memref<4x1x32xf32, #tpu.memory_space<vmem>>, %arg5: memref<4x8x8xf32, #tpu.memory_space<vmem>>, %arg6: memref<2x256xf32, #tpu.memory_space<vmem>>, %arg7: memref<2x256xf32, #tpu.memory_space<vmem>>) attributes {dimension_semantics = [#tpu.dimension_semantics<parallel>], iteration_bounds = array<i64: 1>, scalar_prefetch = 0 : i64, scratch_operands = 0 : i64, tpu.core_type = #tpu.core_type<tc>, window_params = [{transform_indices = @transform_0, window_bounds = array<i64: 2, 8, 32>}, {transform_indices = @transform_1, window_bounds = array<i64: 2, 8, 32>}, {pipeline_mode = #tpu.pipeline_mode<synchronous>, transform_indices = @transform_2, window_bounds = array<i64: 4, 32, 32>}, {pipeline_mode = #tpu.pipeline_mode<synchronous>, transform_indices = @transform_3, window_bounds = array<i64: 4, 1, 32>}, {pipeline_mode = #tpu.pipeline_mode<synchronous>, transform_indices = @transform_4, window_bounds = array<i64: 4, 8, 8>}, {transform_indices = @transform_5, window_bounds = array<i64: 2, 256>}, {transform_indices = @transform_6, window_bounds = array<i64: 2, 256>}]} {
    %c0 = arith.constant 0 : index
    %c0_0 = arith.constant 0 : index
    %c0_1 = arith.constant 0 : index
    %0 = vector.load %arg3[%c0, %c0_0, %c0_1] : memref<4x32x32xf32, #tpu.memory_space<vmem>>, vector<1x32x32xf32>
    %1 = vector.shape_cast %0 : vector<1x32x32xf32> to vector<32x32xf32>
    %c1 = arith.constant 1 : index
    %c0_2 = arith.constant 0 : index
    %c0_3 = arith.constant 0 : index
    %2 = vector.load %arg3[%c1, %c0_2, %c0_3] : memref<4x32x32xf32, #tpu.memory_space<vmem>>, vector<1x32x32xf32>
    %3 = vector.shape_cast %2 : vector<1x32x32xf32> to vector<32x32xf32>
    %c2 = arith.constant 2 : index
    %c0_4 = arith.constant 0 : index
    %c0_5 = arith.constant 0 : index
    %4 = vector.load %arg3[%c2, %c0_4, %c0_5] : memref<4x32x32xf32, #tpu.memory_space<vmem>>, vector<1x32x32xf32>
    %5 = vector.shape_cast %4 : vector<1x32x32xf32> to vector<32x32xf32>
    %c3 = arith.constant 3 : index
    %c0_6 = arith.constant 0 : index
    %c0_7 = arith.constant 0 : index
    %6 = vector.load %arg3[%c3, %c0_6, %c0_7] : memref<4x32x32xf32, #tpu.memory_space<vmem>>, vector<1x32x32xf32>
    %7 = vector.shape_cast %6 : vector<1x32x32xf32> to vector<32x32xf32>
    %c0_8 = arith.constant 0 : index
    %c0_9 = arith.constant 0 : index
    %c0_10 = arith.constant 0 : index
    %8 = vector.load %arg4[%c0_8, %c0_9, %c0_10] : memref<4x1x32xf32, #tpu.memory_space<vmem>>, vector<1x1x32xf32>
    %9 = vector.shape_cast %8 : vector<1x1x32xf32> to vector<1x32xf32>
    %c1_11 = arith.constant 1 : index
    %c0_12 = arith.constant 0 : index
    %c0_13 = arith.constant 0 : index
    %10 = vector.load %arg4[%c1_11, %c0_12, %c0_13] : memref<4x1x32xf32, #tpu.memory_space<vmem>>, vector<1x1x32xf32>
    %11 = vector.shape_cast %10 : vector<1x1x32xf32> to vector<1x32xf32>
    %c2_14 = arith.constant 2 : index
    %c0_15 = arith.constant 0 : index
    %c0_16 = arith.constant 0 : index
    %12 = vector.load %arg4[%c2_14, %c0_15, %c0_16] : memref<4x1x32xf32, #tpu.memory_space<vmem>>, vector<1x1x32xf32>
    %13 = vector.shape_cast %12 : vector<1x1x32xf32> to vector<1x32xf32>
    %c3_17 = arith.constant 3 : index
    %c0_18 = arith.constant 0 : index
    %c0_19 = arith.constant 0 : index
    %14 = vector.load %arg4[%c3_17, %c0_18, %c0_19] : memref<4x1x32xf32, #tpu.memory_space<vmem>>, vector<1x1x32xf32>
    %15 = vector.shape_cast %14 : vector<1x1x32xf32> to vector<1x32xf32>
    %16 = vector.extract_strided_slice %7 {offsets = [0, 0], sizes = [8, 32], strides = [1, 1]} : vector<32x32xf32> to vector<8x32xf32>
    %17 = vector.extract_strided_slice %7 {offsets = [8, 0], sizes = [8, 32], strides = [1, 1]} : vector<32x32xf32> to vector<8x32xf32>
    %18 = vector.extract_strided_slice %7 {offsets = [16, 0], sizes = [8, 32], strides = [1, 1]} : vector<32x32xf32> to vector<8x32xf32>
    %19 = vector.extract_strided_slice %7 {offsets = [24, 0], sizes = [8, 32], strides = [1, 1]} : vector<32x32xf32> to vector<8x32xf32>
    %c0_20 = arith.constant 0 : index
    %c0_21 = arith.constant 0 : index
    %c0_22 = arith.constant 0 : index
    %20 = vector.load %arg5[%c0_20, %c0_21, %c0_22] : memref<4x8x8xf32, #tpu.memory_space<vmem>>, vector<1x8x8xf32>
    %21 = vector.shape_cast %20 : vector<1x8x8xf32> to vector<8x8xf32>
    %c1_23 = arith.constant 1 : index
    %c0_24 = arith.constant 0 : index
    %c0_25 = arith.constant 0 : index
    %22 = vector.load %arg5[%c1_23, %c0_24, %c0_25] : memref<4x8x8xf32, #tpu.memory_space<vmem>>, vector<1x8x8xf32>
    %23 = vector.shape_cast %22 : vector<1x8x8xf32> to vector<8x8xf32>
    %c2_26 = arith.constant 2 : index
    %c0_27 = arith.constant 0 : index
    %c0_28 = arith.constant 0 : index
    %24 = vector.load %arg5[%c2_26, %c0_27, %c0_28] : memref<4x8x8xf32, #tpu.memory_space<vmem>>, vector<1x8x8xf32>
    %25 = vector.shape_cast %24 : vector<1x8x8xf32> to vector<8x8xf32>
    %c3_29 = arith.constant 3 : index
    %c0_30 = arith.constant 0 : index
    %c0_31 = arith.constant 0 : index
    %26 = vector.load %arg5[%c3_29, %c0_30, %c0_31] : memref<4x8x8xf32, #tpu.memory_space<vmem>>, vector<1x8x8xf32>
    %27 = vector.shape_cast %26 : vector<1x8x8xf32> to vector<8x8xf32>
    %c0_32 = arith.constant 0 : index
    %c0_33 = arith.constant 0 : index
    %c0_34 = arith.constant 0 : index
    %28 = vector.load %arg1[%c0_32, %c0_33, %c0_34] : memref<2x8x32xf32, #tpu.memory_space<vmem>>, vector<1x8x32xf32>
    %29 = vector.shape_cast %28 : vector<1x8x32xf32> to vector<8x32xf32>
    %c0_35 = arith.constant 0 : index
    %c0_36 = arith.constant 0 : index
    %c0_37 = arith.constant 0 : index
    %30 = vector.load %arg2[%c0_35, %c0_36, %c0_37] : memref<2x8x32xf32, #tpu.memory_space<vmem>>, vector<1x8x32xf32>
    %31 = vector.shape_cast %30 : vector<1x8x32xf32> to vector<8x32xf32>
    %cst = arith.constant dense<0.000000e+00> : vector<8x32xf32>
    %32 = tpu.matmul %29, %1, %cst {dimension_numbers = #tpu.dot_dimension_numbers<[1], [0], [0], [1], [0, 0, 1, 1], [], []>} : vector<8x32xf32>, vector<32x32xf32>, vector<8x32xf32> -> vector<8x32xf32>
    %33 = vector.broadcast %9 : vector<1x32xf32> to vector<8x32xf32>
    %34 = arith.addf %32, %33 : vector<8x32xf32>
    %cst_38 = arith.constant dense<0.000000e+00> : vector<8x32xf32>
    %35 = tpu.matmul %31, %3, %cst_38 {dimension_numbers = #tpu.dot_dimension_numbers<[1], [0], [0], [1], [0, 0, 1, 1], [], []>} : vector<8x32xf32>, vector<32x32xf32>, vector<8x32xf32> -> vector<8x32xf32>
    %36 = vector.broadcast %11 : vector<1x32xf32> to vector<8x32xf32>
    %37 = arith.addf %35, %36 : vector<8x32xf32>
    %cst_39 = arith.constant dense<0.000000e+00> : vector<8x32xf32>
    %38 = tpu.matmul %31, %5, %cst_39 {dimension_numbers = #tpu.dot_dimension_numbers<[1], [0], [0], [1], [0, 0, 1, 1], [], []>} : vector<8x32xf32>, vector<32x32xf32>, vector<8x32xf32> -> vector<8x32xf32>
    %39 = vector.broadcast %13 : vector<1x32xf32> to vector<8x32xf32>
    %40 = arith.addf %38, %39 : vector<8x32xf32>
    %cst_40 = arith.constant 0.000000e+00 : f32
    %41 = vector.broadcast %cst_40 : f32 to vector<8x32xf32>
    %42 = vector.extract_strided_slice %34 {offsets = [0, 0], sizes = [8, 8], strides = [1, 1]} : vector<8x32xf32> to vector<8x8xf32>
    %43 = vector.extract_strided_slice %37 {offsets = [0, 0], sizes = [8, 8], strides = [1, 1]} : vector<8x32xf32> to vector<8x8xf32>
    %cst_41 = arith.constant dense<0.000000e+00> : vector<8x8xf32>
    %44 = tpu.matmul %42, %43, %cst_41 {dimension_numbers = #tpu.dot_dimension_numbers<[1], [1], [0], [0], [0, 0, 1, 0], [], []>} : vector<8x8xf32>, vector<8x8xf32>, vector<8x8xf32> -> vector<8x8xf32>
    %cst_42 = arith.constant 0.353553385 : f32
    %45 = vector.broadcast %cst_42 : f32 to vector<8x8xf32>
    %46 = arith.mulf %44, %45 : vector<8x8xf32>
    %47 = arith.addf %46, %21 : vector<8x8xf32>
    %cst_43 = arith.constant dense<0xFF800000> : vector<8xf32>
    %48 = vector.multi_reduction <maximumf>, %47, %cst_43 [1] : vector<8x8xf32> to vector<8xf32>
    %49 = vector.shape_cast %48 : vector<8xf32> to vector<8x1xf32>
    %50 = vector.broadcast %49 : vector<8x1xf32> to vector<8x8xf32>
    %51 = arith.subf %47, %50 : vector<8x8xf32>
    %52 = math.exp %51 : vector<8x8xf32>
    %cst_44 = arith.constant dense<0.000000e+00> : vector<8xf32>
    %53 = vector.multi_reduction <add>, %52, %cst_44 [1] : vector<8x8xf32> to vector<8xf32>
    %54 = vector.shape_cast %53 : vector<8xf32> to vector<8x1xf32>
    %55 = tpu.reciprocal %54 : vector<8x1xf32> -> vector<8x1xf32>
    %56 = vector.broadcast %55 : vector<8x1xf32> to vector<8x8xf32>
    %57 = arith.mulf %52, %56 : vector<8x8xf32>
    %58 = vector.extract_strided_slice %40 {offsets = [0, 0], sizes = [8, 8], strides = [1, 1]} : vector<8x32xf32> to vector<8x8xf32>
    %cst_45 = arith.constant dense<0.000000e+00> : vector<8x8xf32>
    %59 = tpu.matmul %57, %58, %cst_45 {dimension_numbers = #tpu.dot_dimension_numbers<[1], [0], [0], [1], [0, 0, 1, 1], [], []>} : vector<8x8xf32>, vector<8x8xf32>, vector<8x8xf32> -> vector<8x8xf32>
    %cst_46 = arith.constant dense<0.000000e+00> : vector<8x32xf32>
    %60 = tpu.matmul %59, %16, %cst_46 {dimension_numbers = #tpu.dot_dimension_numbers<[1], [0], [0], [1], [0, 0, 1, 1], [], []>} : vector<8x8xf32>, vector<8x32xf32>, vector<8x32xf32> -> vector<8x32xf32>
    %61 = arith.addf %41, %60 : vector<8x32xf32>
    %62 = vector.extract_strided_slice %34 {offsets = [0, 8], sizes = [8, 8], strides = [1, 1]} : vector<8x32xf32> to vector<8x8xf32>
    %63 = vector.extract_strided_slice %37 {offsets = [0, 8], sizes = [8, 8], strides = [1, 1]} : vector<8x32xf32> to vector<8x8xf32>
    %cst_47 = arith.constant dense<0.000000e+00> : vector<8x8xf32>
    %64 = tpu.matmul %62, %63, %cst_47 {dimension_numbers = #tpu.dot_dimension_numbers<[1], [1], [0], [0], [0, 0, 1, 0], [], []>} : vector<8x8xf32>, vector<8x8xf32>, vector<8x8xf32> -> vector<8x8xf32>
    %cst_48 = arith.constant 0.353553385 : f32
    %65 = vector.broadcast %cst_48 : f32 to vector<8x8xf32>
    %66 = arith.mulf %64, %65 : vector<8x8xf32>
    %67 = arith.addf %66, %23 : vector<8x8xf32>
    %cst_49 = arith.constant dense<0xFF800000> : vector<8xf32>
    %68 = vector.multi_reduction <maximumf>, %67, %cst_49 [1] : vector<8x8xf32> to vector<8xf32>
    %69 = vector.shape_cast %68 : vector<8xf32> to vector<8x1xf32>
    %70 = vector.broadcast %69 : vector<8x1xf32> to vector<8x8xf32>
    %71 = arith.subf %67, %70 : vector<8x8xf32>
    %72 = math.exp %71 : vector<8x8xf32>
    %cst_50 = arith.constant dense<0.000000e+00> : vector<8xf32>
    %73 = vector.multi_reduction <add>, %72, %cst_50 [1] : vector<8x8xf32> to vector<8xf32>
    %74 = vector.shape_cast %73 : vector<8xf32> to vector<8x1xf32>
    %75 = tpu.reciprocal %74 : vector<8x1xf32> -> vector<8x1xf32>
    %76 = vector.broadcast %75 : vector<8x1xf32> to vector<8x8xf32>
    %77 = arith.mulf %72, %76 : vector<8x8xf32>
    %78 = vector.extract_strided_slice %40 {offsets = [0, 8], sizes = [8, 8], strides = [1, 1]} : vector<8x32xf32> to vector<8x8xf32>
    %cst_51 = arith.constant dense<0.000000e+00> : vector<8x8xf32>
    %79 = tpu.matmul %77, %78, %cst_51 {dimension_numbers = #tpu.dot_dimension_numbers<[1], [0], [0], [1], [0, 0, 1, 1], [], []>} : vector<8x8xf32>, vector<8x8xf32>, vector<8x8xf32> -> vector<8x8xf32>
    %cst_52 = arith.constant dense<0.000000e+00> : vector<8x32xf32>
    %80 = tpu.matmul %79, %17, %cst_52 {dimension_numbers = #tpu.dot_dimension_numbers<[1], [0], [0], [1], [0, 0, 1, 1], [], []>} : vector<8x8xf32>, vector<8x32xf32>, vector<8x32xf32> -> vector<8x32xf32>
    %81 = arith.addf %61, %80 : vector<8x32xf32>
    %82 = vector.extract_strided_slice %34 {offsets = [0, 16], sizes = [8, 8], strides = [1, 1]} : vector<8x32xf32> to vector<8x8xf32>
    %83 = vector.extract_strided_slice %37 {offsets = [0, 16], sizes = [8, 8], strides = [1, 1]} : vector<8x32xf32> to vector<8x8xf32>
    %cst_53 = arith.constant dense<0.000000e+00> : vector<8x8xf32>
    %84 = tpu.matmul %82, %83, %cst_53 {dimension_numbers = #tpu.dot_dimension_numbers<[1], [1], [0], [0], [0, 0, 1, 0], [], []>} : vector<8x8xf32>, vector<8x8xf32>, vector<8x8xf32> -> vector<8x8xf32>
    %cst_54 = arith.constant 0.353553385 : f32
    %85 = vector.broadcast %cst_54 : f32 to vector<8x8xf32>
    %86 = arith.mulf %84, %85 : vector<8x8xf32>
    %87 = arith.addf %86, %25 : vector<8x8xf32>
    %cst_55 = arith.constant dense<0xFF800000> : vector<8xf32>
    %88 = vector.multi_reduction <maximumf>, %87, %cst_55 [1] : vector<8x8xf32> to vector<8xf32>
    %89 = vector.shape_cast %88 : vector<8xf32> to vector<8x1xf32>
    %90 = vector.broadcast %89 : vector<8x1xf32> to vector<8x8xf32>
    %91 = arith.subf %87, %90 : vector<8x8xf32>
    %92 = math.exp %91 : vector<8x8xf32>
    %cst_56 = arith.constant dense<0.000000e+00> : vector<8xf32>
    %93 = vector.multi_reduction <add>, %92, %cst_56 [1] : vector<8x8xf32> to vector<8xf32>
    %94 = vector.shape_cast %93 : vector<8xf32> to vector<8x1xf32>
    %95 = tpu.reciprocal %94 : vector<8x1xf32> -> vector<8x1xf32>
    %96 = vector.broadcast %95 : vector<8x1xf32> to vector<8x8xf32>
    %97 = arith.mulf %92, %96 : vector<8x8xf32>
    %98 = vector.extract_strided_slice %40 {offsets = [0, 16], sizes = [8, 8], strides = [1, 1]} : vector<8x32xf32> to vector<8x8xf32>
    %cst_57 = arith.constant dense<0.000000e+00> : vector<8x8xf32>
    %99 = tpu.matmul %97, %98, %cst_57 {dimension_numbers = #tpu.dot_dimension_numbers<[1], [0], [0], [1], [0, 0, 1, 1], [], []>} : vector<8x8xf32>, vector<8x8xf32>, vector<8x8xf32> -> vector<8x8xf32>
    %cst_58 = arith.constant dense<0.000000e+00> : vector<8x32xf32>
    %100 = tpu.matmul %99, %18, %cst_58 {dimension_numbers = #tpu.dot_dimension_numbers<[1], [0], [0], [1], [0, 0, 1, 1], [], []>} : vector<8x8xf32>, vector<8x32xf32>, vector<8x32xf32> -> vector<8x32xf32>
    %101 = arith.addf %81, %100 : vector<8x32xf32>
    %102 = vector.extract_strided_slice %34 {offsets = [0, 24], sizes = [8, 8], strides = [1, 1]} : vector<8x32xf32> to vector<8x8xf32>
    %103 = vector.extract_strided_slice %37 {offsets = [0, 24], sizes = [8, 8], strides = [1, 1]} : vector<8x32xf32> to vector<8x8xf32>
    %cst_59 = arith.constant dense<0.000000e+00> : vector<8x8xf32>
    %104 = tpu.matmul %102, %103, %cst_59 {dimension_numbers = #tpu.dot_dimension_numbers<[1], [1], [0], [0], [0, 0, 1, 0], [], []>} : vector<8x8xf32>, vector<8x8xf32>, vector<8x8xf32> -> vector<8x8xf32>
    %cst_60 = arith.constant 0.353553385 : f32
    %105 = vector.broadcast %cst_60 : f32 to vector<8x8xf32>
    %106 = arith.mulf %104, %105 : vector<8x8xf32>
    %107 = arith.addf %106, %27 : vector<8x8xf32>
    %cst_61 = arith.constant dense<0xFF800000> : vector<8xf32>
    %108 = vector.multi_reduction <maximumf>, %107, %cst_61 [1] : vector<8x8xf32> to vector<8xf32>
    %109 = vector.shape_cast %108 : vector<8xf32> to vector<8x1xf32>
    %110 = vector.broadcast %109 : vector<8x1xf32> to vector<8x8xf32>
    %111 = arith.subf %107, %110 : vector<8x8xf32>
    %112 = math.exp %111 : vector<8x8xf32>
    %cst_62 = arith.constant dense<0.000000e+00> : vector<8xf32>
    %113 = vector.multi_reduction <add>, %112, %cst_62 [1] : vector<8x8xf32> to vector<8xf32>
    %114 = vector.shape_cast %113 : vector<8xf32> to vector<8x1xf32>
    %115 = tpu.reciprocal %114 : vector<8x1xf32> -> vector<8x1xf32>
    %116 = vector.broadcast %115 : vector<8x1xf32> to vector<8x8xf32>
    %117 = arith.mulf %112, %116 : vector<8x8xf32>
    %118 = vector.extract_strided_slice %40 {offsets = [0, 24], sizes = [8, 8], strides = [1, 1]} : vector<8x32xf32> to vector<8x8xf32>
    %cst_63 = arith.constant dense<0.000000e+00> : vector<8x8xf32>
    %119 = tpu.matmul %117, %118, %cst_63 {dimension_numbers = #tpu.dot_dimension_numbers<[1], [0], [0], [1], [0, 0, 1, 1], [], []>} : vector<8x8xf32>, vector<8x8xf32>, vector<8x8xf32> -> vector<8x8xf32>
    %cst_64 = arith.constant dense<0.000000e+00> : vector<8x32xf32>
    %120 = tpu.matmul %119, %19, %cst_64 {dimension_numbers = #tpu.dot_dimension_numbers<[1], [0], [0], [1], [0, 0, 1, 1], [], []>} : vector<8x8xf32>, vector<8x32xf32>, vector<8x32xf32> -> vector<8x32xf32>
    %121 = arith.addf %101, %120 : vector<8x32xf32>
    %122 = vector.broadcast %15 : vector<1x32xf32> to vector<8x32xf32>
    %123 = arith.addf %121, %122 : vector<8x32xf32>
    %124 = vector.shape_cast %123 : vector<8x32xf32> to vector<1x256xf32>
    %c0_65 = arith.constant 0 : index
    %c0_66 = arith.constant 0 : index
    %125 = vector.load %arg6[%c0_65, %c0_66] : memref<2x256xf32, #tpu.memory_space<vmem>>, vector<1x256xf32>
    tpu.vector_store %arg6[%c0_65, %c0_66], %124 {strides = array<i32>} : memref<2x256xf32, #tpu.memory_space<vmem>>, vector<1x256xf32>,
    %126 = vector.shape_cast %57 : vector<8x8xf32> to vector<1x8x8xf32>
    %127 = vector.shape_cast %77 : vector<8x8xf32> to vector<1x8x8xf32>
    %128 = vector.shape_cast %97 : vector<8x8xf32> to vector<1x8x8xf32>
    %129 = vector.shape_cast %117 : vector<8x8xf32> to vector<1x8x8xf32>
    %130 = tpu.concatenate %126, %127, %128, %129 in 0 : vector<1x8x8xf32>, vector<1x8x8xf32>, vector<1x8x8xf32>, vector<1x8x8xf32> -> vector<4x8x8xf32>
    %131 = vector.shape_cast %130 : vector<4x8x8xf32> to vector<1x256xf32>
    %c0_67 = arith.constant 0 : index
    %c0_68 = arith.constant 0 : index
    %132 = vector.load %arg7[%c0_67, %c0_68] : memref<2x256xf32, #tpu.memory_space<vmem>>, vector<1x256xf32>
    tpu.vector_store %arg7[%c0_67, %c0_68], %131 {strides = array<i32>} : memref<2x256xf32, #tpu.memory_space<vmem>>, vector<1x256xf32>,
    %c1_69 = arith.constant 1 : index
    %c0_70 = arith.constant 0 : index
    %c0_71 = arith.constant 0 : index
    %133 = vector.load %arg1[%c1_69, %c0_70, %c0_71] : memref<2x8x32xf32, #tpu.memory_space<vmem>>, vector<1x8x32xf32>
    %134 = vector.shape_cast %133 : vector<1x8x32xf32> to vector<8x32xf32>
    %c1_72 = arith.constant 1 : index
    %c0_73 = arith.constant 0 : index
    %c0_74 = arith.constant 0 : index
    %135 = vector.load %arg2[%c1_72, %c0_73, %c0_74] : memref<2x8x32xf32, #tpu.memory_space<vmem>>, vector<1x8x32xf32>
    %136 = vector.shape_cast %135 : vector<1x8x32xf32> to vector<8x32xf32>
    %cst_75 = arith.constant dense<0.000000e+00> : vector<8x32xf32>
    %137 = tpu.matmul %134, %1, %cst_75 {dimension_numbers = #tpu.dot_dimension_numbers<[1], [0], [0], [1], [0, 0, 1, 1], [], []>} : vector<8x32xf32>, vector<32x32xf32>, vector<8x32xf32> -> vector<8x32xf32>
    %138 = vector.broadcast %9 : vector<1x32xf32> to vector<8x32xf32>
    %139 = arith.addf %137, %138 : vector<8x32xf32>
    %cst_76 = arith.constant dense<0.000000e+00> : vector<8x32xf32>
    %140 = tpu.matmul %136, %3, %cst_76 {dimension_numbers = #tpu.dot_dimension_numbers<[1], [0], [0], [1], [0, 0, 1, 1], [], []>} : vector<8x32xf32>, vector<32x32xf32>, vector<8x32xf32> -> vector<8x32xf32>
    %141 = vector.broadcast %11 : vector<1x32xf32> to vector<8x32xf32>
    %142 = arith.addf %140, %141 : vector<8x32xf32>
    %cst_77 = arith.constant dense<0.000000e+00> : vector<8x32xf32>
    %143 = tpu.matmul %136, %5, %cst_77 {dimension_numbers = #tpu.dot_dimension_numbers<[1], [0], [0], [1], [0, 0, 1, 1], [], []>} : vector<8x32xf32>, vector<32x32xf32>, vector<8x32xf32> -> vector<8x32xf32>
    %144 = vector.broadcast %13 : vector<1x32xf32> to vector<8x32xf32>
    %145 = arith.addf %143, %144 : vector<8x32xf32>
    %cst_78 = arith.constant 0.000000e+00 : f32
    %146 = vector.broadcast %cst_78 : f32 to vector<8x32xf32>
    %147 = vector.extract_strided_slice %139 {offsets = [0, 0], sizes = [8, 8], strides = [1, 1]} : vector<8x32xf32> to vector<8x8xf32>
    %148 = vector.extract_strided_slice %142 {offsets = [0, 0], sizes = [8, 8], strides = [1, 1]} : vector<8x32xf32> to vector<8x8xf32>
    %cst_79 = arith.constant dense<0.000000e+00> : vector<8x8xf32>
    %149 = tpu.matmul %147, %148, %cst_79 {dimension_numbers = #tpu.dot_dimension_numbers<[1], [1], [0], [0], [0, 0, 1, 0], [], []>} : vector<8x8xf32>, vector<8x8xf32>, vector<8x8xf32> -> vector<8x8xf32>
    %cst_80 = arith.constant 0.353553385 : f32
    %150 = vector.broadcast %cst_80 : f32 to vector<8x8xf32>
    %151 = arith.mulf %149, %150 : vector<8x8xf32>
    %152 = arith.addf %151, %21 : vector<8x8xf32>
    %cst_81 = arith.constant dense<0xFF800000> : vector<8xf32>
    %153 = vector.multi_reduction <maximumf>, %152, %cst_81 [1] : vector<8x8xf32> to vector<8xf32>
    %154 = vector.shape_cast %153 : vector<8xf32> to vector<8x1xf32>
    %155 = vector.broadcast %154 : vector<8x1xf32> to vector<8x8xf32>
    %156 = arith.subf %152, %155 : vector<8x8xf32>
    %157 = math.exp %156 : vector<8x8xf32>
    %cst_82 = arith.constant dense<0.000000e+00> : vector<8xf32>
    %158 = vector.multi_reduction <add>, %157, %cst_82 [1] : vector<8x8xf32> to vector<8xf32>
    %159 = vector.shape_cast %158 : vector<8xf32> to vector<8x1xf32>
    %160 = tpu.reciprocal %159 : vector<8x1xf32> -> vector<8x1xf32>
    %161 = vector.broadcast %160 : vector<8x1xf32> to vector<8x8xf32>
    %162 = arith.mulf %157, %161 : vector<8x8xf32>
    %163 = vector.extract_strided_slice %145 {offsets = [0, 0], sizes = [8, 8], strides = [1, 1]} : vector<8x32xf32> to vector<8x8xf32>
    %cst_83 = arith.constant dense<0.000000e+00> : vector<8x8xf32>
    %164 = tpu.matmul %162, %163, %cst_83 {dimension_numbers = #tpu.dot_dimension_numbers<[1], [0], [0], [1], [0, 0, 1, 1], [], []>} : vector<8x8xf32>, vector<8x8xf32>, vector<8x8xf32> -> vector<8x8xf32>
    %cst_84 = arith.constant dense<0.000000e+00> : vector<8x32xf32>
    %165 = tpu.matmul %164, %16, %cst_84 {dimension_numbers = #tpu.dot_dimension_numbers<[1], [0], [0], [1], [0, 0, 1, 1], [], []>} : vector<8x8xf32>, vector<8x32xf32>, vector<8x32xf32> -> vector<8x32xf32>
    %166 = arith.addf %146, %165 : vector<8x32xf32>
    %167 = vector.extract_strided_slice %139 {offsets = [0, 8], sizes = [8, 8], strides = [1, 1]} : vector<8x32xf32> to vector<8x8xf32>
    %168 = vector.extract_strided_slice %142 {offsets = [0, 8], sizes = [8, 8], strides = [1, 1]} : vector<8x32xf32> to vector<8x8xf32>
    %cst_85 = arith.constant dense<0.000000e+00> : vector<8x8xf32>
    %169 = tpu.matmul %167, %168, %cst_85 {dimension_numbers = #tpu.dot_dimension_numbers<[1], [1], [0], [0], [0, 0, 1, 0], [], []>} : vector<8x8xf32>, vector<8x8xf32>, vector<8x8xf32> -> vector<8x8xf32>
    %cst_86 = arith.constant 0.353553385 : f32
    %170 = vector.broadcast %cst_86 : f32 to vector<8x8xf32>
    %171 = arith.mulf %169, %170 : vector<8x8xf32>
    %172 = arith.addf %171, %23 : vector<8x8xf32>
    %cst_87 = arith.constant dense<0xFF800000> : vector<8xf32>
    %173 = vector.multi_reduction <maximumf>, %172, %cst_87 [1] : vector<8x8xf32> to vector<8xf32>
    %174 = vector.shape_cast %173 : vector<8xf32> to vector<8x1xf32>
    %175 = vector.broadcast %174 : vector<8x1xf32> to vector<8x8xf32>
    %176 = arith.subf %172, %175 : vector<8x8xf32>
    %177 = math.exp %176 : vector<8x8xf32>
    %cst_88 = arith.constant dense<0.000000e+00> : vector<8xf32>
    %178 = vector.multi_reduction <add>, %177, %cst_88 [1] : vector<8x8xf32> to vector<8xf32>
    %179 = vector.shape_cast %178 : vector<8xf32> to vector<8x1xf32>
    %180 = tpu.reciprocal %179 : vector<8x1xf32> -> vector<8x1xf32>
    %181 = vector.broadcast %180 : vector<8x1xf32> to vector<8x8xf32>
    %182 = arith.mulf %177, %181 : vector<8x8xf32>
    %183 = vector.extract_strided_slice %145 {offsets = [0, 8], sizes = [8, 8], strides = [1, 1]} : vector<8x32xf32> to vector<8x8xf32>
    %cst_89 = arith.constant dense<0.000000e+00> : vector<8x8xf32>
    %184 = tpu.matmul %182, %183, %cst_89 {dimension_numbers = #tpu.dot_dimension_numbers<[1], [0], [0], [1], [0, 0, 1, 1], [], []>} : vector<8x8xf32>, vector<8x8xf32>, vector<8x8xf32> -> vector<8x8xf32>
    %cst_90 = arith.constant dense<0.000000e+00> : vector<8x32xf32>
    %185 = tpu.matmul %184, %17, %cst_90 {dimension_numbers = #tpu.dot_dimension_numbers<[1], [0], [0], [1], [0, 0, 1, 1], [], []>} : vector<8x8xf32>, vector<8x32xf32>, vector<8x32xf32> -> vector<8x32xf32>
    %186 = arith.addf %166, %185 : vector<8x32xf32>
    %187 = vector.extract_strided_slice %139 {offsets = [0, 16], sizes = [8, 8], strides = [1, 1]} : vector<8x32xf32> to vector<8x8xf32>
    %188 = vector.extract_strided_slice %142 {offsets = [0, 16], sizes = [8, 8], strides = [1, 1]} : vector<8x32xf32> to vector<8x8xf32>
    %cst_91 = arith.constant dense<0.000000e+00> : vector<8x8xf32>
    %189 = tpu.matmul %187, %188, %cst_91 {dimension_numbers = #tpu.dot_dimension_numbers<[1], [1], [0], [0], [0, 0, 1, 0], [], []>} : vector<8x8xf32>, vector<8x8xf32>, vector<8x8xf32> -> vector<8x8xf32>
    %cst_92 = arith.constant 0.353553385 : f32
    %190 = vector.broadcast %cst_92 : f32 to vector<8x8xf32>
    %191 = arith.mulf %189, %190 : vector<8x8xf32>
    %192 = arith.addf %191, %25 : vector<8x8xf32>
    %cst_93 = arith.constant dense<0xFF800000> : vector<8xf32>
    %193 = vector.multi_reduction <maximumf>, %192, %cst_93 [1] : vector<8x8xf32> to vector<8xf32>
    %194 = vector.shape_cast %193 : vector<8xf32> to vector<8x1xf32>
    %195 = vector.broadcast %194 : vector<8x1xf32> to vector<8x8xf32>
    %196 = arith.subf %192, %195 : vector<8x8xf32>
    %197 = math.exp %196 : vector<8x8xf32>
    %cst_94 = arith.constant dense<0.000000e+00> : vector<8xf32>
    %198 = vector.multi_reduction <add>, %197, %cst_94 [1] : vector<8x8xf32> to vector<8xf32>
    %199 = vector.shape_cast %198 : vector<8xf32> to vector<8x1xf32>
    %200 = tpu.reciprocal %199 : vector<8x1xf32> -> vector<8x1xf32>
    %201 = vector.broadcast %200 : vector<8x1xf32> to vector<8x8xf32>
    %202 = arith.mulf %197, %201 : vector<8x8xf32>
    %203 = vector.extract_strided_slice %145 {offsets = [0, 16], sizes = [8, 8], strides = [1, 1]} : vector<8x32xf32> to vector<8x8xf32>
    %cst_95 = arith.constant dense<0.000000e+00> : vector<8x8xf32>
    %204 = tpu.matmul %202, %203, %cst_95 {dimension_numbers = #tpu.dot_dimension_numbers<[1], [0], [0], [1], [0, 0, 1, 1], [], []>} : vector<8x8xf32>, vector<8x8xf32>, vector<8x8xf32> -> vector<8x8xf32>
    %cst_96 = arith.constant dense<0.000000e+00> : vector<8x32xf32>
    %205 = tpu.matmul %204, %18, %cst_96 {dimension_numbers = #tpu.dot_dimension_numbers<[1], [0], [0], [1], [0, 0, 1, 1], [], []>} : vector<8x8xf32>, vector<8x32xf32>, vector<8x32xf32> -> vector<8x32xf32>
    %206 = arith.addf %186, %205 : vector<8x32xf32>
    %207 = vector.extract_strided_slice %139 {offsets = [0, 24], sizes = [8, 8], strides = [1, 1]} : vector<8x32xf32> to vector<8x8xf32>
    %208 = vector.extract_strided_slice %142 {offsets = [0, 24], sizes = [8, 8], strides = [1, 1]} : vector<8x32xf32> to vector<8x8xf32>
    %cst_97 = arith.constant dense<0.000000e+00> : vector<8x8xf32>
    %209 = tpu.matmul %207, %208, %cst_97 {dimension_numbers = #tpu.dot_dimension_numbers<[1], [1], [0], [0], [0, 0, 1, 0], [], []>} : vector<8x8xf32>, vector<8x8xf32>, vector<8x8xf32> -> vector<8x8xf32>
    %cst_98 = arith.constant 0.353553385 : f32
    %210 = vector.broadcast %cst_98 : f32 to vector<8x8xf32>
    %211 = arith.mulf %209, %210 : vector<8x8xf32>
    %212 = arith.addf %211, %27 : vector<8x8xf32>
    %cst_99 = arith.constant dense<0xFF800000> : vector<8xf32>
    %213 = vector.multi_reduction <maximumf>, %212, %cst_99 [1] : vector<8x8xf32> to vector<8xf32>
    %214 = vector.shape_cast %213 : vector<8xf32> to vector<8x1xf32>
    %215 = vector.broadcast %214 : vector<8x1xf32> to vector<8x8xf32>
    %216 = arith.subf %212, %215 : vector<8x8xf32>
    %217 = math.exp %216 : vector<8x8xf32>
    %cst_100 = arith.constant dense<0.000000e+00> : vector<8xf32>
    %218 = vector.multi_reduction <add>, %217, %cst_100 [1] : vector<8x8xf32> to vector<8xf32>
    %219 = vector.shape_cast %218 : vector<8xf32> to vector<8x1xf32>
    %220 = tpu.reciprocal %219 : vector<8x1xf32> -> vector<8x1xf32>
    %221 = vector.broadcast %220 : vector<8x1xf32> to vector<8x8xf32>
    %222 = arith.mulf %217, %221 : vector<8x8xf32>
    %223 = vector.extract_strided_slice %145 {offsets = [0, 24], sizes = [8, 8], strides = [1, 1]} : vector<8x32xf32> to vector<8x8xf32>
    %cst_101 = arith.constant dense<0.000000e+00> : vector<8x8xf32>
    %224 = tpu.matmul %222, %223, %cst_101 {dimension_numbers = #tpu.dot_dimension_numbers<[1], [0], [0], [1], [0, 0, 1, 1], [], []>} : vector<8x8xf32>, vector<8x8xf32>, vector<8x8xf32> -> vector<8x8xf32>
    %cst_102 = arith.constant dense<0.000000e+00> : vector<8x32xf32>
    %225 = tpu.matmul %224, %19, %cst_102 {dimension_numbers = #tpu.dot_dimension_numbers<[1], [0], [0], [1], [0, 0, 1, 1], [], []>} : vector<8x8xf32>, vector<8x32xf32>, vector<8x32xf32> -> vector<8x32xf32>
    %226 = arith.addf %206, %225 : vector<8x32xf32>
    %227 = vector.broadcast %15 : vector<1x32xf32> to vector<8x32xf32>
    %228 = arith.addf %226, %227 : vector<8x32xf32>
    %229 = vector.shape_cast %228 : vector<8x32xf32> to vector<1x256xf32>
    %c1_103 = arith.constant 1 : index
    %c0_104 = arith.constant 0 : index
    %230 = vector.load %arg6[%c1_103, %c0_104] : memref<2x256xf32, #tpu.memory_space<vmem>>, vector<1x256xf32>
    tpu.vector_store %arg6[%c1_103, %c0_104], %229 {strides = array<i32>} : memref<2x256xf32, #tpu.memory_space<vmem>>, vector<1x256xf32>,
    %231 = vector.shape_cast %162 : vector<8x8xf32> to vector<1x8x8xf32>
    %232 = vector.shape_cast %182 : vector<8x8xf32> to vector<1x8x8xf32>
    %233 = vector.shape_cast %202 : vector<8x8xf32> to vector<1x8x8xf32>
    %234 = vector.shape_cast %222 : vector<8x8xf32> to vector<1x8x8xf32>
    %235 = tpu.concatenate %231, %232, %233, %234 in 0 : vector<1x8x8xf32>, vector<1x8x8xf32>, vector<1x8x8xf32>, vector<1x8x8xf32> -> vector<4x8x8xf32>
    %236 = vector.shape_cast %235 : vector<4x8x8xf32> to vector<1x256xf32>
    %c1_105 = arith.constant 1 : index
    %c0_106 = arith.constant 0 : index
    %237 = vector.load %arg7[%c1_105, %c0_106] : memref<2x256xf32, #tpu.memory_space<vmem>>, vector<1x256xf32>
    tpu.vector_store %arg7[%c1_105, %c0_106], %236 {strides = array<i32>} : memref<2x256xf32, #tpu.memory_space<vmem>>, vector<1x256xf32>,
    return
  }
  func.func @transform_0(%arg0: i32) -> (i32, i32, i32) {
    %c0_i32 = arith.constant 0 : i32
    %c0_i32_0 = arith.constant 0 : i32
    %c0_i32_1 = arith.constant 0 : i32
    return %arg0, %c0_i32, %c0_i32_0 : i32, i32, i32
  }
  func.func @transform_1(%arg0: i32) -> (i32, i32, i32) {
    %c0_i32 = arith.constant 0 : i32
    %c0_i32_0 = arith.constant 0 : i32
    %c0_i32_1 = arith.constant 0 : i32
    return %arg0, %c0_i32, %c0_i32_0 : i32, i32, i32
  }
  func.func @transform_2(%arg0: i32) -> (i32, i32, i32) {
    %c0_i32 = arith.constant 0 : i32
    %c0_i32_0 = arith.constant 0 : i32
    %c0_i32_1 = arith.constant 0 : i32
    %c0_i32_2 = arith.constant 0 : i32
    return %c0_i32, %c0_i32_0, %c0_i32_1 : i32, i32, i32
  }
  func.func @transform_3(%arg0: i32) -> (i32, i32, i32) {
    %c0_i32 = arith.constant 0 : i32
    %c0_i32_0 = arith.constant 0 : i32
    %c0_i32_1 = arith.constant 0 : i32
    %c0_i32_2 = arith.constant 0 : i32
    return %c0_i32, %c0_i32_0, %c0_i32_1 : i32, i32, i32
  }
  func.func @transform_4(%arg0: i32) -> (i32, i32, i32) {
    %c0_i32 = arith.constant 0 : i32
    %c0_i32_0 = arith.constant 0 : i32
    %c0_i32_1 = arith.constant 0 : i32
    %c0_i32_2 = arith.constant 0 : i32
    return %c0_i32, %c0_i32_0, %c0_i32_1 : i32, i32, i32
  }
  func.func @transform_5(%arg0: i32) -> (i32, i32) {
    %c0_i32 = arith.constant 0 : i32
    %c0_i32_0 = arith.constant 0 : i32
    return %arg0, %c0_i32 : i32, i32
  }
  func.func @transform_6(%arg0: i32) -> (i32, i32) {
    %c0_i32 = arith.constant 0 : i32
    %c0_i32_0 = arith.constant 0 : i32
    return %arg0, %c0_i32 : i32, i32
  }
}

module attributes {stable_mosaic.version = 11 : i64} {
  func.func @_ge_attention_kernel(%arg0: i32, %arg1: memref<2x8x32xf32, #tpu.memory_space<vmem>>, %arg2: memref<2x8x32xf32, #tpu.memory_space<vmem>>, %arg3: memref<4x32x32xf32, #tpu.memory_space<vmem>>, %arg4: memref<4x1x32xf32, #tpu.memory_space<vmem>>, %arg5: memref<4x8x8xf32, #tpu.memory_space<vmem>>, %arg6: memref<2x8x32xf32, #tpu.memory_space<vmem>>, %arg7: memref<2x4x8x8xf32, #tpu.memory_space<vmem>>) attributes {dimension_semantics = [#tpu.dimension_semantics<parallel>], iteration_bounds = array<i64: 1>, scalar_prefetch = 0 : i64, scratch_operands = 0 : i64, tpu.core_type = #tpu.core_type<tc>, window_params = [{transform_indices = @transform_0, window_bounds = array<i64: 2, 8, 32>}, {transform_indices = @transform_1, window_bounds = array<i64: 2, 8, 32>}, {pipeline_mode = #tpu.pipeline_mode<synchronous>, transform_indices = @transform_2, window_bounds = array<i64: 4, 32, 32>}, {pipeline_mode = #tpu.pipeline_mode<synchronous>, transform_indices = @transform_3, window_bounds = array<i64: 4, 1, 32>}, {pipeline_mode = #tpu.pipeline_mode<synchronous>, transform_indices = @transform_4, window_bounds = array<i64: 4, 8, 8>}, {transform_indices = @transform_5, window_bounds = array<i64: 2, 8, 32>}, {transform_indices = @transform_6, window_bounds = array<i64: 2, 4, 8, 8>}]} {
    %c0 = arith.constant 0 : index
    %c0_0 = arith.constant 0 : index
    %c0_1 = arith.constant 0 : index
    %0 = vector.load %arg3[%c0, %c0_0, %c0_1] : memref<4x32x32xf32, #tpu.memory_space<vmem>>, vector<1x32x32xf32>
    %1 = vector.shape_cast %0 : vector<1x32x32xf32> to vector<32x32xf32>
    %c1 = arith.constant 1 : index
    %c0_2 = arith.constant 0 : index
    %c0_3 = arith.constant 0 : index
    %2 = vector.load %arg3[%c1, %c0_2, %c0_3] : memref<4x32x32xf32, #tpu.memory_space<vmem>>, vector<1x32x32xf32>
    %3 = vector.shape_cast %2 : vector<1x32x32xf32> to vector<32x32xf32>
    %c2 = arith.constant 2 : index
    %c0_4 = arith.constant 0 : index
    %c0_5 = arith.constant 0 : index
    %4 = vector.load %arg3[%c2, %c0_4, %c0_5] : memref<4x32x32xf32, #tpu.memory_space<vmem>>, vector<1x32x32xf32>
    %5 = vector.shape_cast %4 : vector<1x32x32xf32> to vector<32x32xf32>
    %c3 = arith.constant 3 : index
    %c0_6 = arith.constant 0 : index
    %c0_7 = arith.constant 0 : index
    %6 = vector.load %arg3[%c3, %c0_6, %c0_7] : memref<4x32x32xf32, #tpu.memory_space<vmem>>, vector<1x32x32xf32>
    %7 = vector.shape_cast %6 : vector<1x32x32xf32> to vector<32x32xf32>
    %c0_8 = arith.constant 0 : index
    %c0_9 = arith.constant 0 : index
    %c0_10 = arith.constant 0 : index
    %8 = vector.load %arg4[%c0_8, %c0_9, %c0_10] : memref<4x1x32xf32, #tpu.memory_space<vmem>>, vector<1x1x32xf32>
    %9 = vector.shape_cast %8 : vector<1x1x32xf32> to vector<1x32xf32>
    %c1_11 = arith.constant 1 : index
    %c0_12 = arith.constant 0 : index
    %c0_13 = arith.constant 0 : index
    %10 = vector.load %arg4[%c1_11, %c0_12, %c0_13] : memref<4x1x32xf32, #tpu.memory_space<vmem>>, vector<1x1x32xf32>
    %11 = vector.shape_cast %10 : vector<1x1x32xf32> to vector<1x32xf32>
    %c2_14 = arith.constant 2 : index
    %c0_15 = arith.constant 0 : index
    %c0_16 = arith.constant 0 : index
    %12 = vector.load %arg4[%c2_14, %c0_15, %c0_16] : memref<4x1x32xf32, #tpu.memory_space<vmem>>, vector<1x1x32xf32>
    %13 = vector.shape_cast %12 : vector<1x1x32xf32> to vector<1x32xf32>
    %c3_17 = arith.constant 3 : index
    %c0_18 = arith.constant 0 : index
    %c0_19 = arith.constant 0 : index
    %14 = vector.load %arg4[%c3_17, %c0_18, %c0_19] : memref<4x1x32xf32, #tpu.memory_space<vmem>>, vector<1x1x32xf32>
    %15 = vector.shape_cast %14 : vector<1x1x32xf32> to vector<1x32xf32>
    %16 = vector.extract_strided_slice %7 {offsets = [0, 0], sizes = [8, 32], strides = [1, 1]} : vector<32x32xf32> to vector<8x32xf32>
    %17 = vector.extract_strided_slice %7 {offsets = [8, 0], sizes = [8, 32], strides = [1, 1]} : vector<32x32xf32> to vector<8x32xf32>
    %18 = vector.extract_strided_slice %7 {offsets = [16, 0], sizes = [8, 32], strides = [1, 1]} : vector<32x32xf32> to vector<8x32xf32>
    %19 = vector.extract_strided_slice %7 {offsets = [24, 0], sizes = [8, 32], strides = [1, 1]} : vector<32x32xf32> to vector<8x32xf32>
    %c0_20 = arith.constant 0 : index
    %c0_21 = arith.constant 0 : index
    %c0_22 = arith.constant 0 : index
    %20 = vector.load %arg5[%c0_20, %c0_21, %c0_22] : memref<4x8x8xf32, #tpu.memory_space<vmem>>, vector<1x8x8xf32>
    %21 = vector.shape_cast %20 : vector<1x8x8xf32> to vector<8x8xf32>
    %c1_23 = arith.constant 1 : index
    %c0_24 = arith.constant 0 : index
    %c0_25 = arith.constant 0 : index
    %22 = vector.load %arg5[%c1_23, %c0_24, %c0_25] : memref<4x8x8xf32, #tpu.memory_space<vmem>>, vector<1x8x8xf32>
    %23 = vector.shape_cast %22 : vector<1x8x8xf32> to vector<8x8xf32>
    %c2_26 = arith.constant 2 : index
    %c0_27 = arith.constant 0 : index
    %c0_28 = arith.constant 0 : index
    %24 = vector.load %arg5[%c2_26, %c0_27, %c0_28] : memref<4x8x8xf32, #tpu.memory_space<vmem>>, vector<1x8x8xf32>
    %25 = vector.shape_cast %24 : vector<1x8x8xf32> to vector<8x8xf32>
    %c3_29 = arith.constant 3 : index
    %c0_30 = arith.constant 0 : index
    %c0_31 = arith.constant 0 : index
    %26 = vector.load %arg5[%c3_29, %c0_30, %c0_31] : memref<4x8x8xf32, #tpu.memory_space<vmem>>, vector<1x8x8xf32>
    %27 = vector.shape_cast %26 : vector<1x8x8xf32> to vector<8x8xf32>
    %c0_32 = arith.constant 0 : index
    %c0_33 = arith.constant 0 : index
    %c0_34 = arith.constant 0 : index
    %28 = vector.load %arg1[%c0_32, %c0_33, %c0_34] : memref<2x8x32xf32, #tpu.memory_space<vmem>>, vector<1x8x32xf32>
    %29 = vector.shape_cast %28 : vector<1x8x32xf32> to vector<8x32xf32>
    %c0_35 = arith.constant 0 : index
    %c0_36 = arith.constant 0 : index
    %c0_37 = arith.constant 0 : index
    %30 = vector.load %arg2[%c0_35, %c0_36, %c0_37] : memref<2x8x32xf32, #tpu.memory_space<vmem>>, vector<1x8x32xf32>
    %31 = vector.shape_cast %30 : vector<1x8x32xf32> to vector<8x32xf32>
    %cst = arith.constant dense<0.000000e+00> : vector<8x32xf32>
    %32 = tpu.matmul %29, %1, %cst {dimension_numbers = #tpu.dot_dimension_numbers<[1], [0], [0], [1], [0, 0, 1, 1], [], []>} : vector<8x32xf32>, vector<32x32xf32>, vector<8x32xf32> -> vector<8x32xf32>
    %33 = vector.broadcast %9 : vector<1x32xf32> to vector<8x32xf32>
    %34 = arith.addf %32, %33 : vector<8x32xf32>
    %cst_38 = arith.constant dense<0.000000e+00> : vector<8x32xf32>
    %35 = tpu.matmul %31, %3, %cst_38 {dimension_numbers = #tpu.dot_dimension_numbers<[1], [0], [0], [1], [0, 0, 1, 1], [], []>} : vector<8x32xf32>, vector<32x32xf32>, vector<8x32xf32> -> vector<8x32xf32>
    %36 = vector.broadcast %11 : vector<1x32xf32> to vector<8x32xf32>
    %37 = arith.addf %35, %36 : vector<8x32xf32>
    %cst_39 = arith.constant dense<0.000000e+00> : vector<8x32xf32>
    %38 = tpu.matmul %31, %5, %cst_39 {dimension_numbers = #tpu.dot_dimension_numbers<[1], [0], [0], [1], [0, 0, 1, 1], [], []>} : vector<8x32xf32>, vector<32x32xf32>, vector<8x32xf32> -> vector<8x32xf32>
    %39 = vector.broadcast %13 : vector<1x32xf32> to vector<8x32xf32>
    %40 = arith.addf %38, %39 : vector<8x32xf32>
    %cst_40 = arith.constant 0.000000e+00 : f32
    %41 = vector.broadcast %cst_40 : f32 to vector<8x32xf32>
    %42 = vector.extract_strided_slice %34 {offsets = [0, 0], sizes = [8, 8], strides = [1, 1]} : vector<8x32xf32> to vector<8x8xf32>
    %43 = vector.extract_strided_slice %37 {offsets = [0, 0], sizes = [8, 8], strides = [1, 1]} : vector<8x32xf32> to vector<8x8xf32>
    %cst_41 = arith.constant dense<0.000000e+00> : vector<8x8xf32>
    %44 = tpu.matmul %42, %43, %cst_41 {dimension_numbers = #tpu.dot_dimension_numbers<[1], [1], [0], [0], [0, 0, 1, 0], [], []>} : vector<8x8xf32>, vector<8x8xf32>, vector<8x8xf32> -> vector<8x8xf32>
    %cst_42 = arith.constant 0.353553385 : f32
    %45 = vector.broadcast %cst_42 : f32 to vector<8x8xf32>
    %46 = arith.mulf %44, %45 : vector<8x8xf32>
    %47 = arith.addf %46, %21 : vector<8x8xf32>
    %cst_43 = arith.constant dense<0xFF800000> : vector<8xf32>
    %48 = vector.multi_reduction <maximumf>, %47, %cst_43 [1] : vector<8x8xf32> to vector<8xf32>
    %49 = vector.shape_cast %48 : vector<8xf32> to vector<8x1xf32>
    %50 = vector.broadcast %49 : vector<8x1xf32> to vector<8x8xf32>
    %51 = arith.subf %47, %50 : vector<8x8xf32>
    %52 = math.exp %51 : vector<8x8xf32>
    %cst_44 = arith.constant dense<0.000000e+00> : vector<8xf32>
    %53 = vector.multi_reduction <add>, %52, %cst_44 [1] : vector<8x8xf32> to vector<8xf32>
    %54 = vector.shape_cast %53 : vector<8xf32> to vector<8x1xf32>
    %55 = tpu.reciprocal %54 : vector<8x1xf32> -> vector<8x1xf32>
    %56 = vector.broadcast %55 : vector<8x1xf32> to vector<8x8xf32>
    %57 = arith.mulf %52, %56 : vector<8x8xf32>
    %58 = vector.extract_strided_slice %40 {offsets = [0, 0], sizes = [8, 8], strides = [1, 1]} : vector<8x32xf32> to vector<8x8xf32>
    %cst_45 = arith.constant dense<0.000000e+00> : vector<8x8xf32>
    %59 = tpu.matmul %57, %58, %cst_45 {dimension_numbers = #tpu.dot_dimension_numbers<[1], [0], [0], [1], [0, 0, 1, 1], [], []>} : vector<8x8xf32>, vector<8x8xf32>, vector<8x8xf32> -> vector<8x8xf32>
    %cst_46 = arith.constant dense<0.000000e+00> : vector<8x32xf32>
    %60 = tpu.matmul %59, %16, %cst_46 {dimension_numbers = #tpu.dot_dimension_numbers<[1], [0], [0], [1], [0, 0, 1, 1], [], []>} : vector<8x8xf32>, vector<8x32xf32>, vector<8x32xf32> -> vector<8x32xf32>
    %61 = arith.addf %41, %60 : vector<8x32xf32>
    %62 = vector.extract_strided_slice %34 {offsets = [0, 8], sizes = [8, 8], strides = [1, 1]} : vector<8x32xf32> to vector<8x8xf32>
    %63 = vector.extract_strided_slice %37 {offsets = [0, 8], sizes = [8, 8], strides = [1, 1]} : vector<8x32xf32> to vector<8x8xf32>
    %cst_47 = arith.constant dense<0.000000e+00> : vector<8x8xf32>
    %64 = tpu.matmul %62, %63, %cst_47 {dimension_numbers = #tpu.dot_dimension_numbers<[1], [1], [0], [0], [0, 0, 1, 0], [], []>} : vector<8x8xf32>, vector<8x8xf32>, vector<8x8xf32> -> vector<8x8xf32>
    %cst_48 = arith.constant 0.353553385 : f32
    %65 = vector.broadcast %cst_48 : f32 to vector<8x8xf32>
    %66 = arith.mulf %64, %65 : vector<8x8xf32>
    %67 = arith.addf %66, %23 : vector<8x8xf32>
    %cst_49 = arith.constant dense<0xFF800000> : vector<8xf32>
    %68 = vector.multi_reduction <maximumf>, %67, %cst_49 [1] : vector<8x8xf32> to vector<8xf32>
    %69 = vector.shape_cast %68 : vector<8xf32> to vector<8x1xf32>
    %70 = vector.broadcast %69 : vector<8x1xf32> to vector<8x8xf32>
    %71 = arith.subf %67, %70 : vector<8x8xf32>
    %72 = math.exp %71 : vector<8x8xf32>
    %cst_50 = arith.constant dense<0.000000e+00> : vector<8xf32>
    %73 = vector.multi_reduction <add>, %72, %cst_50 [1] : vector<8x8xf32> to vector<8xf32>
    %74 = vector.shape_cast %73 : vector<8xf32> to vector<8x1xf32>
    %75 = tpu.reciprocal %74 : vector<8x1xf32> -> vector<8x1xf32>
    %76 = vector.broadcast %75 : vector<8x1xf32> to vector<8x8xf32>
    %77 = arith.mulf %72, %76 : vector<8x8xf32>
    %78 = vector.extract_strided_slice %40 {offsets = [0, 8], sizes = [8, 8], strides = [1, 1]} : vector<8x32xf32> to vector<8x8xf32>
    %cst_51 = arith.constant dense<0.000000e+00> : vector<8x8xf32>
    %79 = tpu.matmul %77, %78, %cst_51 {dimension_numbers = #tpu.dot_dimension_numbers<[1], [0], [0], [1], [0, 0, 1, 1], [], []>} : vector<8x8xf32>, vector<8x8xf32>, vector<8x8xf32> -> vector<8x8xf32>
    %cst_52 = arith.constant dense<0.000000e+00> : vector<8x32xf32>
    %80 = tpu.matmul %79, %17, %cst_52 {dimension_numbers = #tpu.dot_dimension_numbers<[1], [0], [0], [1], [0, 0, 1, 1], [], []>} : vector<8x8xf32>, vector<8x32xf32>, vector<8x32xf32> -> vector<8x32xf32>
    %81 = arith.addf %61, %80 : vector<8x32xf32>
    %82 = vector.extract_strided_slice %34 {offsets = [0, 16], sizes = [8, 8], strides = [1, 1]} : vector<8x32xf32> to vector<8x8xf32>
    %83 = vector.extract_strided_slice %37 {offsets = [0, 16], sizes = [8, 8], strides = [1, 1]} : vector<8x32xf32> to vector<8x8xf32>
    %cst_53 = arith.constant dense<0.000000e+00> : vector<8x8xf32>
    %84 = tpu.matmul %82, %83, %cst_53 {dimension_numbers = #tpu.dot_dimension_numbers<[1], [1], [0], [0], [0, 0, 1, 0], [], []>} : vector<8x8xf32>, vector<8x8xf32>, vector<8x8xf32> -> vector<8x8xf32>
    %cst_54 = arith.constant 0.353553385 : f32
    %85 = vector.broadcast %cst_54 : f32 to vector<8x8xf32>
    %86 = arith.mulf %84, %85 : vector<8x8xf32>
    %87 = arith.addf %86, %25 : vector<8x8xf32>
    %cst_55 = arith.constant dense<0xFF800000> : vector<8xf32>
    %88 = vector.multi_reduction <maximumf>, %87, %cst_55 [1] : vector<8x8xf32> to vector<8xf32>
    %89 = vector.shape_cast %88 : vector<8xf32> to vector<8x1xf32>
    %90 = vector.broadcast %89 : vector<8x1xf32> to vector<8x8xf32>
    %91 = arith.subf %87, %90 : vector<8x8xf32>
    %92 = math.exp %91 : vector<8x8xf32>
    %cst_56 = arith.constant dense<0.000000e+00> : vector<8xf32>
    %93 = vector.multi_reduction <add>, %92, %cst_56 [1] : vector<8x8xf32> to vector<8xf32>
    %94 = vector.shape_cast %93 : vector<8xf32> to vector<8x1xf32>
    %95 = tpu.reciprocal %94 : vector<8x1xf32> -> vector<8x1xf32>
    %96 = vector.broadcast %95 : vector<8x1xf32> to vector<8x8xf32>
    %97 = arith.mulf %92, %96 : vector<8x8xf32>
    %98 = vector.extract_strided_slice %40 {offsets = [0, 16], sizes = [8, 8], strides = [1, 1]} : vector<8x32xf32> to vector<8x8xf32>
    %cst_57 = arith.constant dense<0.000000e+00> : vector<8x8xf32>
    %99 = tpu.matmul %97, %98, %cst_57 {dimension_numbers = #tpu.dot_dimension_numbers<[1], [0], [0], [1], [0, 0, 1, 1], [], []>} : vector<8x8xf32>, vector<8x8xf32>, vector<8x8xf32> -> vector<8x8xf32>
    %cst_58 = arith.constant dense<0.000000e+00> : vector<8x32xf32>
    %100 = tpu.matmul %99, %18, %cst_58 {dimension_numbers = #tpu.dot_dimension_numbers<[1], [0], [0], [1], [0, 0, 1, 1], [], []>} : vector<8x8xf32>, vector<8x32xf32>, vector<8x32xf32> -> vector<8x32xf32>
    %101 = arith.addf %81, %100 : vector<8x32xf32>
    %102 = vector.extract_strided_slice %34 {offsets = [0, 24], sizes = [8, 8], strides = [1, 1]} : vector<8x32xf32> to vector<8x8xf32>
    %103 = vector.extract_strided_slice %37 {offsets = [0, 24], sizes = [8, 8], strides = [1, 1]} : vector<8x32xf32> to vector<8x8xf32>
    %cst_59 = arith.constant dense<0.000000e+00> : vector<8x8xf32>
    %104 = tpu.matmul %102, %103, %cst_59 {dimension_numbers = #tpu.dot_dimension_numbers<[1], [1], [0], [0], [0, 0, 1, 0], [], []>} : vector<8x8xf32>, vector<8x8xf32>, vector<8x8xf32> -> vector<8x8xf32>
    %cst_60 = arith.constant 0.353553385 : f32
    %105 = vector.broadcast %cst_60 : f32 to vector<8x8xf32>
    %106 = arith.mulf %104, %105 : vector<8x8xf32>
    %107 = arith.addf %106, %27 : vector<8x8xf32>
    %cst_61 = arith.constant dense<0xFF800000> : vector<8xf32>
    %108 = vector.multi_reduction <maximumf>, %107, %cst_61 [1] : vector<8x8xf32> to vector<8xf32>
    %109 = vector.shape_cast %108 : vector<8xf32> to vector<8x1xf32>
    %110 = vector.broadcast %109 : vector<8x1xf32> to vector<8x8xf32>
    %111 = arith.subf %107, %110 : vector<8x8xf32>
    %112 = math.exp %111 : vector<8x8xf32>
    %cst_62 = arith.constant dense<0.000000e+00> : vector<8xf32>
    %113 = vector.multi_reduction <add>, %112, %cst_62 [1] : vector<8x8xf32> to vector<8xf32>
    %114 = vector.shape_cast %113 : vector<8xf32> to vector<8x1xf32>
    %115 = tpu.reciprocal %114 : vector<8x1xf32> -> vector<8x1xf32>
    %116 = vector.broadcast %115 : vector<8x1xf32> to vector<8x8xf32>
    %117 = arith.mulf %112, %116 : vector<8x8xf32>
    %118 = vector.extract_strided_slice %40 {offsets = [0, 24], sizes = [8, 8], strides = [1, 1]} : vector<8x32xf32> to vector<8x8xf32>
    %cst_63 = arith.constant dense<0.000000e+00> : vector<8x8xf32>
    %119 = tpu.matmul %117, %118, %cst_63 {dimension_numbers = #tpu.dot_dimension_numbers<[1], [0], [0], [1], [0, 0, 1, 1], [], []>} : vector<8x8xf32>, vector<8x8xf32>, vector<8x8xf32> -> vector<8x8xf32>
    %cst_64 = arith.constant dense<0.000000e+00> : vector<8x32xf32>
    %120 = tpu.matmul %119, %19, %cst_64 {dimension_numbers = #tpu.dot_dimension_numbers<[1], [0], [0], [1], [0, 0, 1, 1], [], []>} : vector<8x8xf32>, vector<8x32xf32>, vector<8x32xf32> -> vector<8x32xf32>
    %121 = arith.addf %101, %120 : vector<8x32xf32>
    %122 = vector.broadcast %15 : vector<1x32xf32> to vector<8x32xf32>
    %123 = arith.addf %121, %122 : vector<8x32xf32>
    %c0_65 = arith.constant 0 : index
    %c0_66 = arith.constant 0 : index
    %c0_67 = arith.constant 0 : index
    %124 = vector.load %arg6[%c0_65, %c0_66, %c0_67] : memref<2x8x32xf32, #tpu.memory_space<vmem>>, vector<1x8x32xf32>
    %125 = vector.shape_cast %124 : vector<1x8x32xf32> to vector<8x32xf32>
    %126 = vector.shape_cast %123 : vector<8x32xf32> to vector<1x8x32xf32>
    tpu.vector_store %arg6[%c0_65, %c0_66, %c0_67], %126 {strides = array<i32>} : memref<2x8x32xf32, #tpu.memory_space<vmem>>, vector<1x8x32xf32>,
    %127 = vector.shape_cast %57 : vector<8x8xf32> to vector<1x8x8xf32>
    %128 = vector.shape_cast %77 : vector<8x8xf32> to vector<1x8x8xf32>
    %129 = vector.shape_cast %97 : vector<8x8xf32> to vector<1x8x8xf32>
    %130 = vector.shape_cast %117 : vector<8x8xf32> to vector<1x8x8xf32>
    %131 = tpu.concatenate %127, %128, %129, %130 in 0 : vector<1x8x8xf32>, vector<1x8x8xf32>, vector<1x8x8xf32>, vector<1x8x8xf32> -> vector<4x8x8xf32>
    %c0_68 = arith.constant 0 : index
    %c0_69 = arith.constant 0 : index
    %c0_70 = arith.constant 0 : index
    %c0_71 = arith.constant 0 : index
    %132 = vector.load %arg7[%c0_68, %c0_69, %c0_70, %c0_71] : memref<2x4x8x8xf32, #tpu.memory_space<vmem>>, vector<1x4x8x8xf32>
    %133 = vector.shape_cast %132 : vector<1x4x8x8xf32> to vector<4x8x8xf32>
    %134 = vector.shape_cast %131 : vector<4x8x8xf32> to vector<1x4x8x8xf32>
    tpu.vector_store %arg7[%c0_68, %c0_69, %c0_70, %c0_71], %134 {strides = array<i32>} : memref<2x4x8x8xf32, #tpu.memory_space<vmem>>, vector<1x4x8x8xf32>,
    %c1_72 = arith.constant 1 : index
    %c0_73 = arith.constant 0 : index
    %c0_74 = arith.constant 0 : index
    %135 = vector.load %arg1[%c1_72, %c0_73, %c0_74] : memref<2x8x32xf32, #tpu.memory_space<vmem>>, vector<1x8x32xf32>
    %136 = vector.shape_cast %135 : vector<1x8x32xf32> to vector<8x32xf32>
    %c1_75 = arith.constant 1 : index
    %c0_76 = arith.constant 0 : index
    %c0_77 = arith.constant 0 : index
    %137 = vector.load %arg2[%c1_75, %c0_76, %c0_77] : memref<2x8x32xf32, #tpu.memory_space<vmem>>, vector<1x8x32xf32>
    %138 = vector.shape_cast %137 : vector<1x8x32xf32> to vector<8x32xf32>
    %cst_78 = arith.constant dense<0.000000e+00> : vector<8x32xf32>
    %139 = tpu.matmul %136, %1, %cst_78 {dimension_numbers = #tpu.dot_dimension_numbers<[1], [0], [0], [1], [0, 0, 1, 1], [], []>} : vector<8x32xf32>, vector<32x32xf32>, vector<8x32xf32> -> vector<8x32xf32>
    %140 = vector.broadcast %9 : vector<1x32xf32> to vector<8x32xf32>
    %141 = arith.addf %139, %140 : vector<8x32xf32>
    %cst_79 = arith.constant dense<0.000000e+00> : vector<8x32xf32>
    %142 = tpu.matmul %138, %3, %cst_79 {dimension_numbers = #tpu.dot_dimension_numbers<[1], [0], [0], [1], [0, 0, 1, 1], [], []>} : vector<8x32xf32>, vector<32x32xf32>, vector<8x32xf32> -> vector<8x32xf32>
    %143 = vector.broadcast %11 : vector<1x32xf32> to vector<8x32xf32>
    %144 = arith.addf %142, %143 : vector<8x32xf32>
    %cst_80 = arith.constant dense<0.000000e+00> : vector<8x32xf32>
    %145 = tpu.matmul %138, %5, %cst_80 {dimension_numbers = #tpu.dot_dimension_numbers<[1], [0], [0], [1], [0, 0, 1, 1], [], []>} : vector<8x32xf32>, vector<32x32xf32>, vector<8x32xf32> -> vector<8x32xf32>
    %146 = vector.broadcast %13 : vector<1x32xf32> to vector<8x32xf32>
    %147 = arith.addf %145, %146 : vector<8x32xf32>
    %cst_81 = arith.constant 0.000000e+00 : f32
    %148 = vector.broadcast %cst_81 : f32 to vector<8x32xf32>
    %149 = vector.extract_strided_slice %141 {offsets = [0, 0], sizes = [8, 8], strides = [1, 1]} : vector<8x32xf32> to vector<8x8xf32>
    %150 = vector.extract_strided_slice %144 {offsets = [0, 0], sizes = [8, 8], strides = [1, 1]} : vector<8x32xf32> to vector<8x8xf32>
    %cst_82 = arith.constant dense<0.000000e+00> : vector<8x8xf32>
    %151 = tpu.matmul %149, %150, %cst_82 {dimension_numbers = #tpu.dot_dimension_numbers<[1], [1], [0], [0], [0, 0, 1, 0], [], []>} : vector<8x8xf32>, vector<8x8xf32>, vector<8x8xf32> -> vector<8x8xf32>
    %cst_83 = arith.constant 0.353553385 : f32
    %152 = vector.broadcast %cst_83 : f32 to vector<8x8xf32>
    %153 = arith.mulf %151, %152 : vector<8x8xf32>
    %154 = arith.addf %153, %21 : vector<8x8xf32>
    %cst_84 = arith.constant dense<0xFF800000> : vector<8xf32>
    %155 = vector.multi_reduction <maximumf>, %154, %cst_84 [1] : vector<8x8xf32> to vector<8xf32>
    %156 = vector.shape_cast %155 : vector<8xf32> to vector<8x1xf32>
    %157 = vector.broadcast %156 : vector<8x1xf32> to vector<8x8xf32>
    %158 = arith.subf %154, %157 : vector<8x8xf32>
    %159 = math.exp %158 : vector<8x8xf32>
    %cst_85 = arith.constant dense<0.000000e+00> : vector<8xf32>
    %160 = vector.multi_reduction <add>, %159, %cst_85 [1] : vector<8x8xf32> to vector<8xf32>
    %161 = vector.shape_cast %160 : vector<8xf32> to vector<8x1xf32>
    %162 = tpu.reciprocal %161 : vector<8x1xf32> -> vector<8x1xf32>
    %163 = vector.broadcast %162 : vector<8x1xf32> to vector<8x8xf32>
    %164 = arith.mulf %159, %163 : vector<8x8xf32>
    %165 = vector.extract_strided_slice %147 {offsets = [0, 0], sizes = [8, 8], strides = [1, 1]} : vector<8x32xf32> to vector<8x8xf32>
    %cst_86 = arith.constant dense<0.000000e+00> : vector<8x8xf32>
    %166 = tpu.matmul %164, %165, %cst_86 {dimension_numbers = #tpu.dot_dimension_numbers<[1], [0], [0], [1], [0, 0, 1, 1], [], []>} : vector<8x8xf32>, vector<8x8xf32>, vector<8x8xf32> -> vector<8x8xf32>
    %cst_87 = arith.constant dense<0.000000e+00> : vector<8x32xf32>
    %167 = tpu.matmul %166, %16, %cst_87 {dimension_numbers = #tpu.dot_dimension_numbers<[1], [0], [0], [1], [0, 0, 1, 1], [], []>} : vector<8x8xf32>, vector<8x32xf32>, vector<8x32xf32> -> vector<8x32xf32>
    %168 = arith.addf %148, %167 : vector<8x32xf32>
    %169 = vector.extract_strided_slice %141 {offsets = [0, 8], sizes = [8, 8], strides = [1, 1]} : vector<8x32xf32> to vector<8x8xf32>
    %170 = vector.extract_strided_slice %144 {offsets = [0, 8], sizes = [8, 8], strides = [1, 1]} : vector<8x32xf32> to vector<8x8xf32>
    %cst_88 = arith.constant dense<0.000000e+00> : vector<8x8xf32>
    %171 = tpu.matmul %169, %170, %cst_88 {dimension_numbers = #tpu.dot_dimension_numbers<[1], [1], [0], [0], [0, 0, 1, 0], [], []>} : vector<8x8xf32>, vector<8x8xf32>, vector<8x8xf32> -> vector<8x8xf32>
    %cst_89 = arith.constant 0.353553385 : f32
    %172 = vector.broadcast %cst_89 : f32 to vector<8x8xf32>
    %173 = arith.mulf %171, %172 : vector<8x8xf32>
    %174 = arith.addf %173, %23 : vector<8x8xf32>
    %cst_90 = arith.constant dense<0xFF800000> : vector<8xf32>
    %175 = vector.multi_reduction <maximumf>, %174, %cst_90 [1] : vector<8x8xf32> to vector<8xf32>
    %176 = vector.shape_cast %175 : vector<8xf32> to vector<8x1xf32>
    %177 = vector.broadcast %176 : vector<8x1xf32> to vector<8x8xf32>
    %178 = arith.subf %174, %177 : vector<8x8xf32>
    %179 = math.exp %178 : vector<8x8xf32>
    %cst_91 = arith.constant dense<0.000000e+00> : vector<8xf32>
    %180 = vector.multi_reduction <add>, %179, %cst_91 [1] : vector<8x8xf32> to vector<8xf32>
    %181 = vector.shape_cast %180 : vector<8xf32> to vector<8x1xf32>
    %182 = tpu.reciprocal %181 : vector<8x1xf32> -> vector<8x1xf32>
    %183 = vector.broadcast %182 : vector<8x1xf32> to vector<8x8xf32>
    %184 = arith.mulf %179, %183 : vector<8x8xf32>
    %185 = vector.extract_strided_slice %147 {offsets = [0, 8], sizes = [8, 8], strides = [1, 1]} : vector<8x32xf32> to vector<8x8xf32>
    %cst_92 = arith.constant dense<0.000000e+00> : vector<8x8xf32>
    %186 = tpu.matmul %184, %185, %cst_92 {dimension_numbers = #tpu.dot_dimension_numbers<[1], [0], [0], [1], [0, 0, 1, 1], [], []>} : vector<8x8xf32>, vector<8x8xf32>, vector<8x8xf32> -> vector<8x8xf32>
    %cst_93 = arith.constant dense<0.000000e+00> : vector<8x32xf32>
    %187 = tpu.matmul %186, %17, %cst_93 {dimension_numbers = #tpu.dot_dimension_numbers<[1], [0], [0], [1], [0, 0, 1, 1], [], []>} : vector<8x8xf32>, vector<8x32xf32>, vector<8x32xf32> -> vector<8x32xf32>
    %188 = arith.addf %168, %187 : vector<8x32xf32>
    %189 = vector.extract_strided_slice %141 {offsets = [0, 16], sizes = [8, 8], strides = [1, 1]} : vector<8x32xf32> to vector<8x8xf32>
    %190 = vector.extract_strided_slice %144 {offsets = [0, 16], sizes = [8, 8], strides = [1, 1]} : vector<8x32xf32> to vector<8x8xf32>
    %cst_94 = arith.constant dense<0.000000e+00> : vector<8x8xf32>
    %191 = tpu.matmul %189, %190, %cst_94 {dimension_numbers = #tpu.dot_dimension_numbers<[1], [1], [0], [0], [0, 0, 1, 0], [], []>} : vector<8x8xf32>, vector<8x8xf32>, vector<8x8xf32> -> vector<8x8xf32>
    %cst_95 = arith.constant 0.353553385 : f32
    %192 = vector.broadcast %cst_95 : f32 to vector<8x8xf32>
    %193 = arith.mulf %191, %192 : vector<8x8xf32>
    %194 = arith.addf %193, %25 : vector<8x8xf32>
    %cst_96 = arith.constant dense<0xFF800000> : vector<8xf32>
    %195 = vector.multi_reduction <maximumf>, %194, %cst_96 [1] : vector<8x8xf32> to vector<8xf32>
    %196 = vector.shape_cast %195 : vector<8xf32> to vector<8x1xf32>
    %197 = vector.broadcast %196 : vector<8x1xf32> to vector<8x8xf32>
    %198 = arith.subf %194, %197 : vector<8x8xf32>
    %199 = math.exp %198 : vector<8x8xf32>
    %cst_97 = arith.constant dense<0.000000e+00> : vector<8xf32>
    %200 = vector.multi_reduction <add>, %199, %cst_97 [1] : vector<8x8xf32> to vector<8xf32>
    %201 = vector.shape_cast %200 : vector<8xf32> to vector<8x1xf32>
    %202 = tpu.reciprocal %201 : vector<8x1xf32> -> vector<8x1xf32>
    %203 = vector.broadcast %202 : vector<8x1xf32> to vector<8x8xf32>
    %204 = arith.mulf %199, %203 : vector<8x8xf32>
    %205 = vector.extract_strided_slice %147 {offsets = [0, 16], sizes = [8, 8], strides = [1, 1]} : vector<8x32xf32> to vector<8x8xf32>
    %cst_98 = arith.constant dense<0.000000e+00> : vector<8x8xf32>
    %206 = tpu.matmul %204, %205, %cst_98 {dimension_numbers = #tpu.dot_dimension_numbers<[1], [0], [0], [1], [0, 0, 1, 1], [], []>} : vector<8x8xf32>, vector<8x8xf32>, vector<8x8xf32> -> vector<8x8xf32>
    %cst_99 = arith.constant dense<0.000000e+00> : vector<8x32xf32>
    %207 = tpu.matmul %206, %18, %cst_99 {dimension_numbers = #tpu.dot_dimension_numbers<[1], [0], [0], [1], [0, 0, 1, 1], [], []>} : vector<8x8xf32>, vector<8x32xf32>, vector<8x32xf32> -> vector<8x32xf32>
    %208 = arith.addf %188, %207 : vector<8x32xf32>
    %209 = vector.extract_strided_slice %141 {offsets = [0, 24], sizes = [8, 8], strides = [1, 1]} : vector<8x32xf32> to vector<8x8xf32>
    %210 = vector.extract_strided_slice %144 {offsets = [0, 24], sizes = [8, 8], strides = [1, 1]} : vector<8x32xf32> to vector<8x8xf32>
    %cst_100 = arith.constant dense<0.000000e+00> : vector<8x8xf32>
    %211 = tpu.matmul %209, %210, %cst_100 {dimension_numbers = #tpu.dot_dimension_numbers<[1], [1], [0], [0], [0, 0, 1, 0], [], []>} : vector<8x8xf32>, vector<8x8xf32>, vector<8x8xf32> -> vector<8x8xf32>
    %cst_101 = arith.constant 0.353553385 : f32
    %212 = vector.broadcast %cst_101 : f32 to vector<8x8xf32>
    %213 = arith.mulf %211, %212 : vector<8x8xf32>
    %214 = arith.addf %213, %27 : vector<8x8xf32>
    %cst_102 = arith.constant dense<0xFF800000> : vector<8xf32>
    %215 = vector.multi_reduction <maximumf>, %214, %cst_102 [1] : vector<8x8xf32> to vector<8xf32>
    %216 = vector.shape_cast %215 : vector<8xf32> to vector<8x1xf32>
    %217 = vector.broadcast %216 : vector<8x1xf32> to vector<8x8xf32>
    %218 = arith.subf %214, %217 : vector<8x8xf32>
    %219 = math.exp %218 : vector<8x8xf32>
    %cst_103 = arith.constant dense<0.000000e+00> : vector<8xf32>
    %220 = vector.multi_reduction <add>, %219, %cst_103 [1] : vector<8x8xf32> to vector<8xf32>
    %221 = vector.shape_cast %220 : vector<8xf32> to vector<8x1xf32>
    %222 = tpu.reciprocal %221 : vector<8x1xf32> -> vector<8x1xf32>
    %223 = vector.broadcast %222 : vector<8x1xf32> to vector<8x8xf32>
    %224 = arith.mulf %219, %223 : vector<8x8xf32>
    %225 = vector.extract_strided_slice %147 {offsets = [0, 24], sizes = [8, 8], strides = [1, 1]} : vector<8x32xf32> to vector<8x8xf32>
    %cst_104 = arith.constant dense<0.000000e+00> : vector<8x8xf32>
    %226 = tpu.matmul %224, %225, %cst_104 {dimension_numbers = #tpu.dot_dimension_numbers<[1], [0], [0], [1], [0, 0, 1, 1], [], []>} : vector<8x8xf32>, vector<8x8xf32>, vector<8x8xf32> -> vector<8x8xf32>
    %cst_105 = arith.constant dense<0.000000e+00> : vector<8x32xf32>
    %227 = tpu.matmul %226, %19, %cst_105 {dimension_numbers = #tpu.dot_dimension_numbers<[1], [0], [0], [1], [0, 0, 1, 1], [], []>} : vector<8x8xf32>, vector<8x32xf32>, vector<8x32xf32> -> vector<8x32xf32>
    %228 = arith.addf %208, %227 : vector<8x32xf32>
    %229 = vector.broadcast %15 : vector<1x32xf32> to vector<8x32xf32>
    %230 = arith.addf %228, %229 : vector<8x32xf32>
    %c1_106 = arith.constant 1 : index
    %c0_107 = arith.constant 0 : index
    %c0_108 = arith.constant 0 : index
    %231 = vector.load %arg6[%c1_106, %c0_107, %c0_108] : memref<2x8x32xf32, #tpu.memory_space<vmem>>, vector<1x8x32xf32>
    %232 = vector.shape_cast %231 : vector<1x8x32xf32> to vector<8x32xf32>
    %233 = vector.shape_cast %230 : vector<8x32xf32> to vector<1x8x32xf32>
    tpu.vector_store %arg6[%c1_106, %c0_107, %c0_108], %233 {strides = array<i32>} : memref<2x8x32xf32, #tpu.memory_space<vmem>>, vector<1x8x32xf32>,
    %234 = vector.shape_cast %164 : vector<8x8xf32> to vector<1x8x8xf32>
    %235 = vector.shape_cast %184 : vector<8x8xf32> to vector<1x8x8xf32>
    %236 = vector.shape_cast %204 : vector<8x8xf32> to vector<1x8x8xf32>
    %237 = vector.shape_cast %224 : vector<8x8xf32> to vector<1x8x8xf32>
    %238 = tpu.concatenate %234, %235, %236, %237 in 0 : vector<1x8x8xf32>, vector<1x8x8xf32>, vector<1x8x8xf32>, vector<1x8x8xf32> -> vector<4x8x8xf32>
    %c1_109 = arith.constant 1 : index
    %c0_110 = arith.constant 0 : index
    %c0_111 = arith.constant 0 : index
    %c0_112 = arith.constant 0 : index
    %239 = vector.load %arg7[%c1_109, %c0_110, %c0_111, %c0_112] : memref<2x4x8x8xf32, #tpu.memory_space<vmem>>, vector<1x4x8x8xf32>
    %240 = vector.shape_cast %239 : vector<1x4x8x8xf32> to vector<4x8x8xf32>
    %241 = vector.shape_cast %238 : vector<4x8x8xf32> to vector<1x4x8x8xf32>
    tpu.vector_store %arg7[%c1_109, %c0_110, %c0_111, %c0_112], %241 {strides = array<i32>} : memref<2x4x8x8xf32, #tpu.memory_space<vmem>>, vector<1x4x8x8xf32>,
    return
  }
  func.func @transform_0(%arg0: i32) -> (i32, i32, i32) {
    %c0_i32 = arith.constant 0 : i32
    %c0_i32_0 = arith.constant 0 : i32
    %c0_i32_1 = arith.constant 0 : i32
    return %arg0, %c0_i32, %c0_i32_0 : i32, i32, i32
  }
  func.func @transform_1(%arg0: i32) -> (i32, i32, i32) {
    %c0_i32 = arith.constant 0 : i32
    %c0_i32_0 = arith.constant 0 : i32
    %c0_i32_1 = arith.constant 0 : i32
    return %arg0, %c0_i32, %c0_i32_0 : i32, i32, i32
  }
  func.func @transform_2(%arg0: i32) -> (i32, i32, i32) {
    %c0_i32 = arith.constant 0 : i32
    %c0_i32_0 = arith.constant 0 : i32
    %c0_i32_1 = arith.constant 0 : i32
    %c0_i32_2 = arith.constant 0 : i32
    return %c0_i32, %c0_i32_0, %c0_i32_1 : i32, i32, i32
  }
  func.func @transform_3(%arg0: i32) -> (i32, i32, i32) {
    %c0_i32 = arith.constant 0 : i32
    %c0_i32_0 = arith.constant 0 : i32
    %c0_i32_1 = arith.constant 0 : i32
    %c0_i32_2 = arith.constant 0 : i32
    return %c0_i32, %c0_i32_0, %c0_i32_1 : i32, i32, i32
  }
  func.func @transform_4(%arg0: i32) -> (i32, i32, i32) {
    %c0_i32 = arith.constant 0 : i32
    %c0_i32_0 = arith.constant 0 : i32
    %c0_i32_1 = arith.constant 0 : i32
    %c0_i32_2 = arith.constant 0 : i32
    return %c0_i32, %c0_i32_0, %c0_i32_1 : i32, i32, i32
  }
  func.func @transform_5(%arg0: i32) -> (i32, i32, i32) {
    %c0_i32 = arith.constant 0 : i32
    %c0_i32_0 = arith.constant 0 : i32
    %c0_i32_1 = arith.constant 0 : i32
    return %arg0, %c0_i32, %c0_i32_0 : i32, i32, i32
  }
  func.func @transform_6(%arg0: i32) -> (i32, i32, i32, i32) {
    %c0_i32 = arith.constant 0 : i32
    %c0_i32_0 = arith.constant 0 : i32
    %c0_i32_1 = arith.constant 0 : i32
    %c0_i32_2 = arith.constant 0 : i32
    return %arg0, %c0_i32, %c0_i32_0, %c0_i32_1 : i32, i32, i32, i32
  }
}

</mosaic_0001>

<bundles_post_ra>
// kernel: tpu_custom_call.1
= control target key start
LH: loop header
LB: loop body
LE: loop exit
PB: predicated region body
PF: predicated region fallthrough
CT: control target
= control target key end

     0   :  { %12 = vsyncpa [#allocation3], 0  ;;  %s3519_s0 = inlined_call_operand.hbm [shape: f32[2,8,32], index: 0, kind: input, shape index: {}]   ;;  %s3520_s1 = inlined_call_operand.hbm [shape: f32[2,8,32], index: 1, kind: input, shape index: {}]   ;;  %s3521_s2 = inlined_call_operand.hbm [shape: f32[4,32,32], index: 2, kind: input, shape index: {}]   ;;  %s3522_s3 = inlined_call_operand.vmem [shape: f32[4,1,32], index: 3, kind: input, shape index: {}]   ;;  %s3523_s4 = inlined_call_operand.hbm [shape: f32[4,8,8], index: 4, kind: input, shape index: {}]   ;;  %s3524_s5 = inlined_call_operand.hbm [shape: f32[2,8,32], index: 5, kind: output, shape index: {0}]   ;;  %s3525_s6 = inlined_call_operand.hbm [shape: f32[2,4,8,8], index: 6, kind: output, shape index: {1}]  }
   0x1   :  { %13 = vsyncpa [#allocation6], 0 }
   0x2   :  { %14 = vsyncpa [#allocation9], 0 }
   0x3   :  { %15 = vsyncpa [#allocation4], 0 }
   0x4   :  { %16 = vsyncpa [#allocation12], 0  ;;  %s3074_s21 = smov [#allocation5]   ;;  %s3075_s23 = smov [#allocation2]  }
   0x5   :  { %s34_s22 = sshll.u32 %s3074_s21, 4  ;;  %s22_s24 = sshll.u32 %s3075_s23, 4  ;;  %s35_s22 = int_to_ptr.vmem [resolvable:$true] %s34_s22  ;;  %s3123_s24 = int_to_ptr.vmem [resolvable:$true] %s22_s24 }
   0x6   :  { %s2932_s27 = scalar_lea.hbm %s3520_s1, 256 }
   0x7   :  { %p2933_p0 = scmp.ne.s32.totalorder %s3520_s1, %s2932_s27  ;;  %p2936_p1 = scmp.lt.u32.totalorder %s2932_s27, %s3520_s1 }
   0x9   :  { %p2938_p2 = pnand %p2936_p1, %p2933_p0 }
   0xb   :  { %2941 = shalt.err (!%p2938_p2)
}
   0xc   :  { %s2942_s8 = scalar_lea.vmem %s35_s22, 256  ;;  %p2947_p4 = scmp.lt.s32.totalorder %s35_s22, %s35_s22 }
   0xd   :  { %p2943_p3 = scmp.ne.s32.totalorder %s35_s22, %s2942_s8  ;;  %p2948_p5 = scmp.lt.s32.totalorder %s2942_s8, %s2942_s8 }
   0xf   :  { %p2949_p6 = por %p2948_p5, %p2947_p4 }
  0x11   :  { %p2950_p7 = pnand %p2949_p6, %p2943_p3 }
  0x13   :  { %2953 = shalt.err (!%p2950_p7)
}
  0x14   :  { %s3076_s9 = smov 128   ;;  %s3077_s10 = smov 8  }
  0x15   :  { %40 = dma.hbm_to_vmem [thread:$0]  %s3520_s1, 256, %s35_s22, [#allocation6], %s3076_s9, %s3076_s9, %s3077_s10  }
  0x16   :  { %s2954_s15 = scalar_lea.hbm %s3519_s0, 256 }
  0x17   :  { %p2955_p8 = scmp.ne.s32.totalorder %s3519_s0, %s2954_s15  ;;  %p2958_p9 = scmp.lt.u32.totalorder %s2954_s15, %s3519_s0 }
  0x19   :  { %p2960_p10 = pnand %p2958_p9, %p2955_p8 }
  0x1b   :  { %2963 = shalt.err (!%p2960_p10)
}
  0x1c   :  { %s2964_s20 = scalar_lea.vmem %s3123_s24, 256  ;;  %p2969_p12 = scmp.lt.s32.totalorder %s3123_s24, %s3123_s24 }
  0x1d   :  { %p2965_p11 = scmp.ne.s32.totalorder %s3123_s24, %s2964_s20  ;;  %p2970_p13 = scmp.lt.s32.totalorder %s2964_s20, %s2964_s20 }
  0x1f   :  { %p2971_p0 = por %p2970_p13, %p2969_p12 }
  0x21   :  { %p2972_p1 = pnand %p2971_p0, %p2965_p11 }
  0x23   :  { %2975 = shalt.err (!%p2972_p1)
}
  0x24   :  { %28 = dma.hbm_to_vmem [thread:$0]  %s3519_s0, 256, %s3123_s24, [#allocation3], %s3076_s9, %s3076_s9, %s3077_s10  }
  0x25   :  { %s3078_s22 = smov [#allocation7]   ;;  %s3079_s25 = smov [#allocation8]  }
  0x26   :  { %s46_s23 = sshll.u32 %s3078_s22, 4  ;;  %s60_s26 = sshll.u32 %s3079_s25, 4  ;;  %s47_s23 = int_to_ptr.vmem [resolvable:$true] %s46_s23  ;;  %s3160_s26 = int_to_ptr.vmem [resolvable:$true] %s60_s26 }
  0x27   :  { %s2976_s29 = scalar_lea.hbm %s3521_s2, 2048 }
  0x28   :  { %p2977_p2 = scmp.ne.s32.totalorder %s3521_s2, %s2976_s29  ;;  %p2980_p3 = scmp.lt.u32.totalorder %s2976_s29, %s3521_s2 }
  0x2a   :  { %p2982_p4 = pnand %p2980_p3, %p2977_p2 }
  0x2c   :  { %2985 = shalt.err (!%p2982_p4)
}
  0x2d   :  { %s2986_s0 = scalar_lea.vmem %s47_s23, 2048  ;;  %p2991_p6 = scmp.lt.s32.totalorder %s47_s23, %s47_s23 }
  0x2e   :  { %p2987_p5 = scmp.ne.s32.totalorder %s47_s23, %s2986_s0  ;;  %p2992_p7 = scmp.lt.s32.totalorder %s2986_s0, %s2986_s0 }
  0x30   :  { %p2993_p8 = por %p2992_p7, %p2991_p6 }
  0x32   :  { %p2994_p9 = pnand %p2993_p8, %p2987_p5 }
  0x34   :  { %2997 = shalt.err (!%p2994_p9)
}
  0x35   :  { %52 = dma.hbm_to_vmem [thread:$0]  %s3521_s2, 2048, %s47_s23, [#allocation6], %s3076_s9, %s3076_s9, %s3077_s10  }
  0x36   :  { %s2998_s15 = scalar_lea.hbm %s3523_s4, 512 }
  0x37   :  { %p2999_p10 = scmp.ne.s32.totalorder %s3523_s4, %s2998_s15  ;;  %p3002_p11 = scmp.lt.u32.totalorder %s2998_s15, %s3523_s4 }
  0x39   :  { %p3004_p12 = pnand %p3002_p11, %p2999_p10 }
  0x3b   :  { %3007 = shalt.err (!%p3004_p12)
}
  0x3c   :  { %s3008_s20 = scalar_lea.vmem %s3160_s26, 512  ;;  %p3013_p0 = scmp.lt.s32.totalorder %s3160_s26, %s3160_s26 }
  0x3d   :  { %p3009_p13 = scmp.ne.s32.totalorder %s3160_s26, %s3008_s20  ;;  %p3014_p1 = scmp.lt.s32.totalorder %s3008_s20, %s3008_s20 }
  0x3f   :  { %p3015_p2 = por %p3014_p1, %p3013_p0 }
  0x41   :  { %p3016_p3 = pnand %p3015_p2, %p3009_p13 }
  0x43   :  { %3019 = shalt.err (!%p3016_p3)
}
  0x44   :  { %66 = dma.hbm_to_vmem [thread:$0]  %s3523_s4, 512, %s3160_s26, [#allocation9], %s3076_s9, %s3076_s9, %s3077_s10  }
  0x45   :  { %3064 = dma.done.wait [#allocation3], 256  }
  0x46   :  { %3065 = vsyncadd [#allocation3], 4294967040 }
  0x47   :  { %3066 = dma.done.wait [#allocation6], 2304  }
  0x48   :  { %3067 = vsyncadd [#allocation6], 4294964992 }
  0x49   :  { %3068 = dma.done.wait [#allocation9], 512  }
  0x4a   :  { %3069 = vsyncadd [#allocation9], 4294966784  ;;  %v3080_v0 = vmov 0.0|0.0   ;;  %vm3081_vm0 = vmmov 0   ;;  %v3082_v1 = vmov 0.0   ;;  %v84_v2 = vld [vmem:[#allocation7 + $0x20] sm:$0xff] }
  0x4b   :  { %2856 = vmatprep.subr.bf16.mxu1 %v3080_v0  ;;  %2850 = vmatprep.subr.bf16.mxu0 %v3080_v0  ;;  %v85_v3 = vld [vmem:[#allocation7 + $0x28] sm:$0xff]  ;;  %v79_v4 = vld [vmem:[#allocation7] sm:$0xff]  ;;  %v86_v7 = vld [vmem:[#allocation7 + $0x30] sm:$0xff]  ;;  %vm120_vm1 = vcmask 261120   ;;  %vm349_vm2 = vcmask 64512   ;;  %s3083_s25 = smov 120  }
  0x4c   :  { %2683 = vmatprep.mubr.msk.f32.mxu1 %vm3081_vm0, %v3082_v1  ;;  %2672 = vmatprep.mubr.msk.f32.mxu0 %vm3081_vm0, %v3082_v1  ;;  %v3203_v5 = vpack.c.bf16 %v85_v3, %v84_v2  ;;  %v80_v6 = vld [vmem:[#allocation7 + $0x8] sm:$0xff]  ;;  %v87_v8 = vld [vmem:[#allocation7 + $0x38] sm:$0xff]  ;;  %v81_v10 = vld [vmem:[#allocation7 + $0x10] sm:$0xff]  ;;  %s3084_s28 = smov 112   ;;  %s3085_s29 = smov 104  }
  0x4d   :  { %v3205_v9 = vpack.c.bf16 %v80_v6, %v79_v4  ;;  %v82_v11 = vld [vmem:[#allocation7 + $0x18] sm:$0xff]  ;;  %v3208_v12 = vpack.c.bf16 %v87_v8, %v86_v7  ;;  %v113_v14 = vld [vmem:[#allocation5] sm:$0xff]  ;;  %v112_v15 = vld [vmem:[#allocation2] sm:$0xff] }
  0x4e   :  { %2858 = vmatpush3.bf16.msra.mxu1 %v3203_v5  ;;  %v3212_v13 = vpack.c.bf16 %v82_v11, %v81_v10  ;;  %v89_v16 = vld [vmem:[#allocation7 + $0x40] sm:$0xff]  ;;  %v90_v17 = vld [vmem:[#allocation7 + $0x48] sm:$0xff]  ;;  %v91_v18 = vld [vmem:[#allocation7 + $0x50] sm:$0xff] }
  0x4f   :  { %2852 = vmatpush3.bf16.msra.mxu0 %v3205_v9  ;;  %2859 = vmatprep.subr.bf16.mxu1 %v3080_v0  ;;  %v3225_v19 = vpack.c.bf16 %v90_v17, %v89_v16  ;;  %v92_v20 = vld [vmem:[#allocation7 + $0x58] sm:$0xff]  ;;  %v3239_v22 = vld [vmem:[%s3522_s3 + $0x1] ss:$0 sm:$0xff]  ;;  %v3244_v23 = vld [vmem:[%s3522_s3] ss:$0 sm:$0xff] }
  0x50   :  { %2853 = vmatprep.subr.bf16.mxu0 %v3080_v0  ;;  %v3228_v21 = vpack.c.bf16 %v92_v20, %v91_v18  ;;  %v3262_v30 = vld [vmem:[%s3522_s3 + $0x2] ss:$0 sm:$0xff]  ;;  %v3278_v43 = vld [vmem:[#allocation8 + $0x8] sm:$0xff] }
  0x51   :  { %v3274_v37 = vld [vmem:[#allocation8] sm:$0xff]  ;;  %v3296_v61 = vld [vmem:[#allocation7 + $0x68] sm:$0xff] }
  0x52   :  { %2861 = vmatpush3.bf16.msra.mxu1 %v3208_v12  ;;  %v3301_v4 = vld [vmem:[#allocation7 + $0x60] sm:$0xff] }
  0x53   :  { %2855 = vmatpush3.bf16.msra.mxu0 %v3212_v13  ;;  %2697 = vmatprep.subr.mxu1 %v3082_v1 }
  0x54   :  { %2862 = vmatprep.subr.bf16.mxu0 %v3080_v0 }
  0x55   :  { %2684 = vmatmul.mubr.msk.f32.vlgmr.msra.gmra.mrb[0].mxu1 %vm120_vm1, %v113_v14 }
  0x56   :  { %2673 = vmatmul.mubr.msk.f32.vlgmr.msra.gmra.mrb[0].mxu0 %vm120_vm1, %v112_v15  ;;  %2699 = vmatprep.mubr.msk.f32.mxu1 %vm3081_vm0, %v3082_v1 }
  0x57   :  { %2694 = vmatprep.mubr.msk.f32.mxu0 %vm3081_vm0, %v3082_v1  ;;  %2864 = vmatpush3.bf16.msra.mxu0 %v3225_v19 }
  0x58   :  { %2865 = vmatprep.subr.bf16.mxu0 %v3080_v0 }
  0x5b   :  { %2867 = vmatpush3.bf16.msra.mxu0 %v3228_v21 }
  0x5c   :  { %2707 = vmatprep.subr.mxu0 %v3082_v1 }
  0x5e   :  { %2695 = vmatmul.mubr.msk.f32.vlgmr.msra.gmra.mrb[2].mxu0 %vm120_vm1, %v113_v14 }
  0x5f   :  { %2709 = vmatprep.mubr.msk.f32.mxu0 %vm3081_vm0, %v3082_v1 }
 0x128   :  { %v269_v24 = vpop.f32.mrb[0].mxu1 }
 0x129   :  { %v270_v25 = vadd.f32 %v3239_v22, %v269_v24  ;;  %v2685_v26 = vpop.f32.mrb[1].mxu1  ;;  %v190_v27 = vpop.f32.mrb[0].mxu0 }
 0x12a   :  { %v3248_v28 = vadd.f32 %v3244_v23, %v190_v27  ;;  %v2674_v29 = vpop.f32.mrb[1].mxu0  ;;  %v3321_v26 = vld [vmem:[#allocation8 + $0x10] sm:$0xff] }
 0x12b   :  { %514 = vrot.lane.b32.xlu0 %v270_v25, %s3083_s25  ;;  %2698 = vmatpush3.xpose.msk.msra.mxu1 %vm349_vm2, %v270_v25 }
 0x12c   :  { %2702 = vmatprep.subr.mxu1 %v3082_v1 }
 0x12e   :  { %2700 = vmatmul.mubr.msk.f32.vlgmr.msra.gmra.mrb[2].mxu1 %vm349_vm2, %v3248_v28 }
 0x12f   :  { %512 = vrot.lane.b32.xlu0 %v3248_v28, %s3083_s25  ;;  %2704 = vmatprep.mubr.msk.f32.mxu1 %vm3081_vm0, %v3082_v1 }
 0x131   :  { %v345_v31 = vpop.f32.mrb[2].mxu0 }
 0x132   :  { %v3265_v32 = vadd.f32 %v3262_v30, %v345_v31  ;;  %v2696_v33 = vpop.f32.mrb[3].mxu0 }
 0x134   :  { %2703 = vmatpush3.msra.mxu1 %v3265_v32 }
 0x135   :  { %2712 = vmatprep.subr.mxu1 %v3082_v1 }
 0x19d   :  { %v515_v34 = vpop.permute.xlu0 %514 }
 0x19e   :  { %2708 = vmatpush3.xpose.msk.msra.mxu0 %vm349_vm2, %v515_v34 }
 0x19f   :  { %2717 = vmatprep.subr.mxu0 %v3082_v1 }
 0x1a1   :  { %v513_v35 = vpop.permute.xlu0 %512 }
 0x1a2   :  { %2710 = vmatmul.mubr.msk.f32.vlgmr.msra.gmra.mrb[4].mxu0 %vm349_vm2, %v513_v35 }
 0x1a3   :  { %2719 = vmatprep.mubr.msk.f32.mxu0 %vm3081_vm0, %v3082_v1  ;;  %2718 = vmatpush3.msra.mxu0 %v3296_v61 }
 0x1a4   :  { %2727 = vmatprep.subr.mxu0 %v3082_v1 }
 0x201   :  { %v422_v36 = vpop.f32.mrb[2].mxu1 }
 0x202   :  { %v426_v38 = vmul.f32 0.35355338, %v422_v36  ;;  %v2701_v39 = vpop.f32.mrb[3].mxu1 }
 0x204   :  { %v427_v40 = vadd.f32 %v426_v38, %v3274_v37 }
 0x206   :  { %v428_v41 = vsel %vm349_vm2, %v427_v40, -inf }
 0x207   :  { %429 = vmax.xlane.f32.xlu1 %v428_v41 }
 0x275   :  { %v586_v42 = vpop.f32.mrb[4].mxu0 }
 0x276   :  { %v590_v44 = vmul.f32 0.35355338, %v586_v42  ;;  %v2711_v45 = vpop.f32.mrb[5].mxu0 }
 0x278   :  { %v591_v46 = vadd.f32 %v590_v44, %v3278_v43 }
 0x27a   :  { %v592_v47 = vsel %vm349_vm2, %v591_v46, -inf }
 0x27b   :  { %593 = vmax.xlane.f32.xlu1 %v592_v47 }
 0x294   :  { %v430_v48 = vpop.xlane.xlu1 %429 }
 0x295   :  { %v431_v49 = vsub.f32 %v427_v40, %v430_v48 }
 0x297   :  { %v432_v50 = vmul.f32 1.442695, %v431_v49  ;;  %v3344_v49 = vld [vmem:[#allocation8 + $0x18] sm:$0xff] }
 0x299   :  { %2900 = vpow2.f32 %v432_v50 }
 0x2a3   :  { %v2901_v51 = vpop.eup %2900 }
 0x2a4   :  { %v434_v52 = vsel %vm349_vm2, %v2901_v51, 0.0 }
 0x2a5   :  { %435 = vadd.xlane.f32.xlu0 %v434_v52 }
 0x2bb   :  { %917 = vrot.lane.b32.xlu0 %v3265_v32, %s3084_s28 }
 0x2bf   :  { %1069 = vrot.lane.b32.xlu0 %v270_v25, %s3085_s29 }
 0x308   :  { %v594_v53 = vpop.xlane.xlu1 %593 }
 0x309   :  { %v595_v54 = vsub.f32 %v591_v46, %v594_v53 }
 0x30b   :  { %v596_v55 = vmul.f32 1.442695, %v595_v54 }
 0x30d   :  { %2902 = vpow2.f32 %v596_v55 }
 0x317   :  { %v2903_v56 = vpop.eup %2902 }
 0x318   :  { %v598_v57 = vsel %vm349_vm2, %v2903_v56, 0.0 }
 0x319   :  { %599 = vadd.xlane.f32.xlu1 %v598_v57 }
 0x32a   :  { %604 = vrot.lane.b32.xlu1 %v3265_v32, %s3083_s25 }
 0x32e   :  { %828 = vrot.lane.b32.xlu1 %v270_v25, %s3084_s28 }
 0x332   :  { %v436_v58 = vpop.xlane.xlu0 %435  ;;  %826 = vrot.lane.b32.xlu1 %v3248_v28, %s3084_s28 }
 0x333   :  { %2904 = vrcp.f32 %v436_v58 }
 0x336   :  { %v918_v7 = vpop.permute.xlu0 %917 }
 0x33a   :  { %v1070_v40 = vpop.permute.xlu0 %1069 }
 0x33d   :  { %v2905_v59 = vpop.eup %2904 }
 0x33e   :  { %v438_v60 = vmul.f32 %v2905_v59, %v2901_v51  ;;  %v3351_v59 = vld [vmem:[#allocation7 + $0x78] sm:$0xff] }
 0x340   :  { %1316 = vst.msk [vmem:[#allocation11] sm:$0xff] %vm349_vm2, %v438_v60  ;;  %2705 = vmatmul.mubr.msk.f32.vlgmr.msra.gmra.mrb[4].mxu1 %vm349_vm2, %v438_v60 }
 0x341   :  { %2714 = vmatprep.mubr.msk.f32.mxu1 %vm3081_vm0, %v3082_v1 }
 0x3a6   :  { %v600_v62 = vpop.xlane.xlu1 %599 }
 0x3a7   :  { %2906 = vrcp.f32 %v600_v62 }
 0x3aa   :  { %v605_v63 = vpop.permute.xlu1 %604 }
 0x3ab   :  { %2713 = vmatpush3.msra.mxu1 %v605_v63 }
 0x3ac   :  { %2722 = vmatprep.subr.mxu1 %v3082_v1 }
 0x3ae   :  { %v829_v10 = vpop.permute.xlu1 %828 }
 0x3b1   :  { %v2907_v2 = vpop.eup %2906 }
 0x3b2   :  { %v602_v3 = vmul.f32 %v2907_v2, %v2903_v56  ;;  %v827_v15 = vpop.permute.xlu1 %826 }
 0x3b4   :  { %1317 = vst.msk [vmem:[#allocation11 + $0x8] sm:$0xff] %vm349_vm2, %v602_v3  ;;  %2715 = vmatmul.mubr.msk.f32.vlgmr.msra.gmra.mrb[6].mxu1 %vm349_vm2, %v602_v3 }
 0x3b5   :  { %2723 = vmatpush3.msra.mxu1 %v3301_v4  ;;  %2724 = vmatprep.mubr.msk.f32.mxu1 %vm3081_vm0, %v3082_v1 }
 0x3b6   :  { %2732 = vmatprep.subr.mxu1 %v3082_v1 }
 0x413   :  { %v508_v6 = vpop.f32.mrb[4].mxu1 }
 0x414   :  { %v2706_v8 = vpop.f32.mrb[5].mxu1  ;;  %2725 = vmatmul.mubr.msk.f32.vlgmr.msra.gmra.mrb[8].mxu1 %vm349_vm2, %v508_v6 }
 0x415   :  { %2733 = vmatpush3.msra.mxu1 %v918_v7  ;;  %2734 = vmatprep.mubr.msk.f32.mxu1 %vm3081_vm0, %v3082_v1 }
 0x416   :  { %2742 = vmatprep.subr.mxu1 %v3082_v1 }
 0x487   :  { %v676_v11 = vpop.f32.mrb[6].mxu1 }
 0x488   :  { %v2716_v14 = vpop.f32.mrb[7].mxu1  ;;  %2720 = vmatmul.mubr.msk.f32.vlgmr.msra.gmra.mrb[6].mxu0 %vm349_vm2, %v676_v11 }
 0x489   :  { %2728 = vmatpush3.xpose.msk.msra.mxu0 %vm349_vm2, %v829_v10  ;;  %2729 = vmatprep.mubr.msk.f32.mxu0 %vm3081_vm0, %v3082_v1 }
 0x48a   :  { %2737 = vmatprep.subr.mxu0 %v3082_v1 }
 0x48c   :  { %2730 = vmatmul.mubr.msk.f32.vlgmr.msra.gmra.mrb[8].mxu0 %vm349_vm2, %v827_v15 }
 0x48d   :  { %2739 = vmatprep.mubr.msk.f32.mxu0 %vm3081_vm0, %v3082_v1 }
 0x4e7   :  { %v822_v16 = vpop.f32.mrb[8].mxu1 }
 0x4e8   :  { %v2726_v17 = vpop.f32.mrb[9].mxu1 }
 0x55b   :  { %v749_v18 = vpop.f32.mrb[6].mxu0 }
 0x55c   :  { %v823_v20 = vadd.f32 %v822_v16, %v749_v18  ;;  %v2721_v24 = vpop.f32.mrb[7].mxu0 }
 0x55f   :  { %v900_v25 = vpop.f32.mrb[8].mxu0 }
 0x560   :  { %v904_v27 = vmul.f32 0.35355338, %v900_v25  ;;  %v2731_v29 = vpop.f32.mrb[9].mxu0 }
 0x562   :  { %v905_v31 = vadd.f32 %v904_v27, %v3321_v26 }
 0x564   :  { %v906_v33 = vsel %vm349_vm2, %v905_v31, -inf }
 0x565   :  { %907 = vmax.xlane.f32.xlu1 %v906_v33 }
 0x5f2   :  { %v908_v34 = vpop.xlane.xlu1 %907 }
 0x5f3   :  { %v909_v35 = vsub.f32 %v905_v31, %v908_v34 }
 0x5f5   :  { %v910_v36 = vmul.f32 1.442695, %v909_v35 }
 0x5f7   :  { %2908 = vpow2.f32 %v910_v36 }
 0x601   :  { %v2909_v38 = vpop.eup %2908 }
 0x602   :  { %v912_v39 = vsel %vm349_vm2, %v2909_v38, 0.0 }
 0x603   :  { %913 = vadd.xlane.f32.xlu0 %v912_v39 }
 0x619   :  { %1067 = vrot.lane.b32.xlu0 %v3248_v28, %s3085_s29  ;;  %v3337_v28 = vld [vmem:[#allocation7 + $0x70] sm:$0xff] }
 0x61a   :  { %2738 = vmatpush3.msra.mxu0 %v3337_v28 }
 0x61b   :  { %2747 = vmatprep.subr.mxu0 %v3082_v1 }
 0x690   :  { %v914_v41 = vpop.xlane.xlu0 %913 }
 0x691   :  { %2910 = vrcp.f32 %v914_v41 }
 0x694   :  { %v1068_v45 = vpop.permute.xlu0 %1067 }
 0x69b   :  { %v2911_v42 = vpop.eup %2910 }
 0x69c   :  { %v916_v44 = vmul.f32 %v2911_v42, %v2909_v38 }
 0x69e   :  { %1318 = vst.msk [vmem:[#allocation11 + $0x10] sm:$0xff] %vm349_vm2, %v916_v44  ;;  %2735 = vmatmul.mubr.msk.f32.vlgmr.msra.gmra.mrb[10].mxu1 %vm349_vm2, %v916_v44 }
 0x69f   :  { %2743 = vmatpush3.xpose.msk.msra.mxu1 %vm349_vm2, %v1070_v40  ;;  %2744 = vmatprep.mubr.msk.f32.mxu1 %vm3081_vm0, %v3082_v1 }
 0x6a0   :  { %2752 = vmatprep.subr.mxu1 %v3082_v1 }
 0x6a2   :  { %2745 = vmatmul.mubr.msk.f32.vlgmr.msra.gmra.mrb[12].mxu1 %vm349_vm2, %v1068_v45 }
 0x6a3   :  { %2754 = vmatprep.mubr.msk.f32.mxu1 %vm3081_vm0, %v3082_v1  ;;  %2753 = vmatpush3.msra.mxu1 %v3351_v59 }
 0x6a4   :  { %2874 = vmatprep.subr.bf16.mxu1 %v3080_v0 }
 0x771   :  { %v989_v46 = vpop.f32.mrb[10].mxu1 }
 0x772   :  { %v2736_v47 = vpop.f32.mrb[11].mxu1  ;;  %2740 = vmatmul.mubr.msk.f32.vlgmr.msra.gmra.mrb[10].mxu0 %vm349_vm2, %v989_v46 }
 0x773   :  { %2749 = vmatprep.mubr.msk.f32.mxu0 %vm3081_vm0, %v3082_v1 }
 0x775   :  { %v1141_v48 = vpop.f32.mrb[12].mxu1 }
 0x776   :  { %v1145_v50 = vmul.f32 0.35355338, %v1141_v48  ;;  %v2746_v51 = vpop.f32.mrb[13].mxu1 }
 0x778   :  { %v1146_v52 = vadd.f32 %v1145_v50, %v3344_v49 }
 0x77a   :  { %v1147_v53 = vsel %vm349_vm2, %v1146_v52, -inf }
 0x77b   :  { %1148 = vmax.xlane.f32.xlu0 %v1147_v53 }
 0x808   :  { %v1149_v54 = vpop.xlane.xlu0 %1148 }
 0x809   :  { %v1150_v55 = vsub.f32 %v1146_v52, %v1149_v54 }
 0x80b   :  { %v1151_v56 = vmul.f32 1.442695, %v1150_v55 }
 0x80d   :  { %2912 = vpow2.f32 %v1151_v56 }
 0x817   :  { %v2913_v57 = vpop.eup %2912 }
 0x818   :  { %v1153_v58 = vsel %vm349_vm2, %v2913_v57, 0.0 }
 0x819   :  { %1154 = vadd.xlane.f32.xlu1 %v1153_v58 }
 0x82a   :  { %1158 = vrot.lane.b32.xlu1 %v3265_v32, %s3085_s29  ;;  %v1321_v32 = vld [vmem:[#allocation2 + $0x8] sm:$0xff] }
 0x845   :  { %v1062_v60 = vpop.f32.mrb[10].mxu0 }
 0x846   :  { %v1066_v62 = vadd.f32 %v1062_v60, %v823_v20  ;;  %v2741_v63 = vpop.f32.mrb[11].mxu0 }
 0x8a6   :  { %v1155_v2 = vpop.xlane.xlu1 %1154 }
 0x8a7   :  { %2914 = vrcp.f32 %v1155_v2 }
 0x8aa   :  { %v1159_v3 = vpop.permute.xlu1 %1158 }
 0x8ab   :  { %2748 = vmatpush3.msra.mxu0 %v1159_v3 }
 0x8ac   :  { %2868 = vmatprep.subr.bf16.mxu0 %v3080_v0 }
 0x8b1   :  { %v2915_v6 = vpop.eup %2914 }
 0x8b2   :  { %v1157_v7 = vmul.f32 %v2915_v6, %v2913_v57 }
 0x8b4   :  { %1319 = vst.msk [vmem:[#allocation11 + $0x18] sm:$0xff] %vm349_vm2, %v1157_v7  ;;  %2750 = vmatmul.mubr.msk.f32.vlgmr.msra.gmra.mrb[12].mxu0 %vm349_vm2, %v1157_v7 }
 0x8b5   :  { %2870 = vmatpush3.bf16.msra.mxu0 %v3205_v9  ;;  %2765 = vmatprep.mubr.msk.f32.mxu0 %vm3081_vm0, %v3082_v1  ;;  %v1323_v9 = vld [vmem:[#allocation5 + $0x8] sm:$0xff] }
 0x8b6   :  { %2871 = vmatprep.subr.bf16.mxu0 %v3080_v0 }
 0x8b9   :  { %2873 = vmatpush3.bf16.msra.mxu0 %v3212_v13 }
 0x8ba   :  { %2880 = vmatprep.subr.bf16.mxu0 %v3080_v0 }
 0x8bc   :  { %2766 = vmatmul.mubr.msk.f32.vlgmr.msra.gmra.mrb[14].mxu0 %vm120_vm1, %v1321_v32 }
 0x8bd   :  { %2882 = vmatpush3.bf16.msra.mxu0 %v3225_v19  ;;  %2787 = vmatprep.mubr.msk.f32.mxu0 %vm3081_vm0, %v3082_v1 }
 0x8be   :  { %2883 = vmatprep.subr.bf16.mxu0 %v3080_v0 }
 0x8c1   :  { %2885 = vmatpush3.bf16.msra.mxu0 %v3228_v21 }
 0x8c2   :  { %2800 = vmatprep.subr.mxu0 %v3082_v1 }
 0x8c4   :  { %2788 = vmatmul.mubr.msk.f32.vlgmr.msra.gmra.mrb[16].mxu0 %vm120_vm1, %v1323_v9 }
 0x8c5   :  { %2802 = vmatprep.mubr.msk.f32.mxu0 %vm3081_vm0, %v3082_v1 }
 0x987   :  { %v1230_v13 = vpop.f32.mrb[12].mxu0 }
 0x988   :  { %v2751_v8 = vpop.f32.mrb[13].mxu0  ;;  %2755 = vmatmul.mubr.msk.f32.vlgmr.msra.gmra.mrb[14].mxu1 %vm349_vm2, %v1230_v13 }
 0x989   :  { %2876 = vmatpush3.bf16.msra.mxu1 %v3203_v5  ;;  %2776 = vmatprep.mubr.msk.f32.mxu1 %vm3081_vm0, %v3082_v1  ;;  %v3387_v5 = vld [vmem:[%s3522_s3 + $0x3] ss:$0 sm:$0xff]  ;;  %s3086_s3 = smov [#allocation11]  }
 0x98a   :  { %2877 = vmatprep.subr.bf16.mxu1 %v3080_v0  ;;  %s2523_s8 = sshll.u32 %s3086_s3, 4  ;;  %s2524_s8 = int_to_ptr.vmem [resolvable:$true] %s2523_s8 }
 0x98b   :  { %s3020_s11 = scalar_lea.vmem %s2524_s8, 1024  ;;  %p3025_p5 = scmp.lt.s32.totalorder %s2524_s8, %s2524_s8 }
 0x98c   :  { %p3021_p4 = scmp.ne.s32.totalorder %s2524_s8, %s3020_s11  ;;  %p3026_p6 = scmp.lt.s32.totalorder %s3020_s11, %s3020_s11 }
 0x98d   :  { %2879 = vmatpush3.bf16.msra.mxu1 %v3208_v12 }
 0x98e   :  { %2790 = vmatprep.subr.mxu1 %v3082_v1  ;;  %p3027_p7 = por %p3026_p6, %p3025_p5 }
 0x98f   :  { %v1393_v19 = vpop.f32.mrb[14].mxu0 }
 0x990   :  { %2777 = vmatmul.mubr.msk.f32.vlgmr.msra.gmra.mrb[16].mxu1 %vm120_vm1, %v1323_v9  ;;  %v2767_v21 = vpop.f32.mrb[15].mxu0  ;;  %v3395_v17 = vadd.f32 %v3244_v23, %v1393_v19  ;;  %p3028_p8 = pnand %p3027_p7, %p3021_p4 }
 0x991   :  { %2792 = vmatprep.mubr.msk.f32.mxu1 %vm3081_vm0, %v3082_v1 }
 0xa5b   :  { %v1303_v10 = vpop.f32.mrb[14].mxu1 }
 0xa5c   :  { %v1307_v11 = vadd.f32 %v1303_v10, %v1066_v62  ;;  %v2756_v14 = vpop.f32.mrb[15].mxu1 }
 0xa5e   :  { %v1314_v0 = vadd.f32 %v3387_v5, %v1307_v11 }
 0xa60   :  { %1315 = vst.msk [vmem:[#allocation10] sm:$0xff] %vm120_vm1, %v1314_v0 }
 0xa63   :  { %v1466_v12 = vpop.f32.mrb[16].mxu1 }
 0xa64   :  { %v3392_v15 = vadd.f32 %v3239_v22, %v1466_v12  ;;  %v2778_v16 = vpop.f32.mrb[17].mxu1  ;;  %v1536_v22 = vpop.f32.mrb[16].mxu0 }
 0xa65   :  { %v3409_v23 = vadd.f32 %v3262_v30, %v1536_v22  ;;  %v2789_v18 = vpop.f32.mrb[17].mxu0 }
 0xa66   :  { %1704 = vrot.lane.b32.xlu1 %v3392_v15, %s3083_s25  ;;  %2791 = vmatpush3.xpose.msk.msra.mxu1 %vm349_vm2, %v3392_v15 }
 0xa67   :  { %2795 = vmatprep.subr.mxu1 %v3082_v1 }
 0xa69   :  { %2793 = vmatmul.mubr.msk.f32.vlgmr.msra.gmra.mrb[18].mxu1 %vm349_vm2, %v3395_v17 }
 0xa6a   :  { %1702 = vrot.lane.b32.xlu1 %v3395_v17, %s3083_s25  ;;  %2797 = vmatprep.mubr.msk.f32.mxu1 %vm3081_vm0, %v3082_v1 }
 0xa6b   :  { %2796 = vmatpush3.msra.mxu1 %v3409_v23 }
 0xa6c   :  { %2805 = vmatprep.subr.mxu1 %v3082_v1 }
 0xad8   :  { %v1705_v20 = vpop.permute.xlu1 %1704 }
 0xad9   :  { %2801 = vmatpush3.xpose.msk.msra.mxu0 %vm349_vm2, %v1705_v20 }
 0xada   :  { %2810 = vmatprep.subr.mxu0 %v3082_v1 }
 0xadc   :  { %v1703_v24 = vpop.permute.xlu1 %1702 }
 0xadd   :  { %2803 = vmatmul.mubr.msk.f32.vlgmr.msra.gmra.mrb[18].mxu0 %vm349_vm2, %v1703_v24 }
 0xade   :  { %2811 = vmatpush3.msra.mxu0 %v3296_v61  ;;  %2812 = vmatprep.mubr.msk.f32.mxu0 %vm3081_vm0, %v3082_v1 }
 0xadf   :  { %2820 = vmatprep.subr.mxu0 %v3082_v1 }
 0xb3c   :  { %v1612_v30 = vpop.f32.mrb[18].mxu1 }
 0xb3d   :  { %v1616_v25 = vmul.f32 0.35355338, %v1612_v30  ;;  %v2794_v27 = vpop.f32.mrb[19].mxu1 }
 0xb3f   :  { %v1617_v29 = vadd.f32 %v1616_v25, %v3274_v37 }
 0xb41   :  { %v1618_v31 = vsel %vm349_vm2, %v1617_v29, -inf }
 0xb42   :  { %1619 = vmax.xlane.f32.xlu1 %v1618_v31 }
 0xb53   :  { %2016 = vrot.lane.b32.xlu1 %v3395_v17, %s3084_s28 }
 0xbb0   :  { %v1776_v33 = vpop.f32.mrb[18].mxu0 }
 0xbb1   :  { %v1780_v34 = vmul.f32 0.35355338, %v1776_v33  ;;  %v2804_v35 = vpop.f32.mrb[19].mxu0 }
 0xbb3   :  { %v1781_v61 = vadd.f32 %v1780_v34, %v3278_v43 }
 0xbb5   :  { %v1782_v36 = vsel %vm349_vm2, %v1781_v61, -inf }
 0xbb6   :  { %1783 = vmax.xlane.f32.xlu0 %v1782_v36 }
 0xbcf   :  { %v1620_v38 = vpop.xlane.xlu1 %1619 }
 0xbd0   :  { %v1621_v39 = vsub.f32 %v1617_v29, %v1620_v38 }
 0xbd2   :  { %v1622_v40 = vmul.f32 1.442695, %v1621_v39 }
 0xbd4   :  { %2916 = vpow2.f32 %v1622_v40 }
 0xbde   :  { %v2917_v41 = vpop.eup %2916 }
 0xbdf   :  { %v1624_v37 = vsel %vm349_vm2, %v2917_v41, 0.0 }
 0xbe0   :  { %1625 = vadd.xlane.f32.xlu0 %v1624_v37 }
 0xc43   :  { %v1784_v42 = vpop.xlane.xlu0 %1783 }
 0xc44   :  { %v1785_v44 = vsub.f32 %v1781_v61, %v1784_v42 }
 0xc46   :  { %v1786_v45 = vmul.f32 1.442695, %v1785_v44 }
 0xc48   :  { %2918 = vpow2.f32 %v1786_v45 }
 0xc52   :  { %v2919_v46 = vpop.eup %2918 }
 0xc53   :  { %v1788_v47 = vsel %vm349_vm2, %v2919_v46, 0.0 }
 0xc54   :  { %1789 = vadd.xlane.f32.xlu0 %v1788_v47 }
 0xc6a   :  { %1794 = vrot.lane.b32.xlu0 %v3409_v23, %s3083_s25 }
 0xc6d   :  { %v1626_v43 = vpop.xlane.xlu0 %1625 }
 0xc6e   :  { %2920 = vrcp.f32 %v1626_v43  ;;  %2018 = vrot.lane.b32.xlu0 %v3392_v15, %s3084_s28 }
 0xc78   :  { %v2921_v48 = vpop.eup %2920 }
 0xc79   :  { %v1628_v50 = vmul.f32 %v2921_v48, %v2917_v41 }
 0xc7b   :  { %2502 = vst.msk [vmem:[#allocation11 + $0x20] sm:$0xff] %vm349_vm2, %v1628_v50  ;;  %2798 = vmatmul.mubr.msk.f32.vlgmr.msra.gmra.mrb[20].mxu1 %vm349_vm2, %v1628_v50 }
 0xc7c   :  { %2807 = vmatprep.mubr.msk.f32.mxu1 %vm3081_vm0, %v3082_v1 }
 0xce1   :  { %v1790_v51 = vpop.xlane.xlu0 %1789 }
 0xce2   :  { %2922 = vrcp.f32 %v1790_v51 }
 0xce5   :  { %v1795_v52 = vpop.permute.xlu0 %1794 }
 0xce6   :  { %2806 = vmatpush3.msra.mxu1 %v1795_v52 }
 0xce7   :  { %2815 = vmatprep.subr.mxu1 %v3082_v1 }
 0xce9   :  { %v2019_v58 = vpop.permute.xlu0 %2018 }
 0xcec   :  { %v2923_v53 = vpop.eup %2922 }
 0xced   :  { %v1792_v54 = vmul.f32 %v2923_v53, %v2919_v46 }
 0xcef   :  { %2503 = vst.msk [vmem:[#allocation11 + $0x28] sm:$0xff] %vm349_vm2, %v1792_v54  ;;  %2808 = vmatmul.mubr.msk.f32.vlgmr.msra.gmra.mrb[22].mxu1 %vm349_vm2, %v1792_v54 }
 0xcf0   :  { %2816 = vmatpush3.msra.mxu1 %v3301_v4  ;;  %2817 = vmatprep.mubr.msk.f32.mxu1 %vm3081_vm0, %v3082_v1  ;;  %v2017_v4 = vpop.permute.xlu1 %2016 }
 0xcf1   :  { %2825 = vmatprep.subr.mxu1 %v3082_v1 }
 0xd4e   :  { %v1698_v55 = vpop.f32.mrb[20].mxu1 }
 0xd4f   :  { %v2799_v56 = vpop.f32.mrb[21].mxu1  ;;  %2818 = vmatmul.mubr.msk.f32.vlgmr.msra.gmra.mrb[24].mxu1 %vm349_vm2, %v1698_v55 }
 0xd50   :  { %2827 = vmatprep.mubr.msk.f32.mxu1 %vm3081_vm0, %v3082_v1 }
 0xdc2   :  { %v1866_v57 = vpop.f32.mrb[22].mxu1 }
 0xdc3   :  { %v2809_v60 = vpop.f32.mrb[23].mxu1  ;;  %2813 = vmatmul.mubr.msk.f32.vlgmr.msra.gmra.mrb[20].mxu0 %vm349_vm2, %v1866_v57 }
 0xdc4   :  { %2821 = vmatpush3.xpose.msk.msra.mxu0 %vm349_vm2, %v2019_v58  ;;  %2822 = vmatprep.mubr.msk.f32.mxu0 %vm3081_vm0, %v3082_v1 }
 0xdc5   :  { %2830 = vmatprep.subr.mxu0 %v3082_v1 }
 0xdc7   :  { %2823 = vmatmul.mubr.msk.f32.vlgmr.msra.gmra.mrb[22].mxu0 %vm349_vm2, %v2017_v4 }
 0xdc8   :  { %2831 = vmatpush3.msra.mxu0 %v3337_v28  ;;  %2832 = vmatprep.mubr.msk.f32.mxu0 %vm3081_vm0, %v3082_v1 }
 0xdc9   :  { %2840 = vmatprep.subr.mxu0 %v3082_v1 }
 0xe22   :  { %v2012_v62 = vpop.f32.mrb[24].mxu1 }
 0xe23   :  { %v2819_v63 = vpop.f32.mrb[25].mxu1 }
 0xe96   :  { %v1939_v2 = vpop.f32.mrb[20].mxu0 }
 0xe97   :  { %v2013_v3 = vadd.f32 %v2012_v62, %v1939_v2  ;;  %v2814_v6 = vpop.f32.mrb[21].mxu0 }
 0xe9a   :  { %v2090_v7 = vpop.f32.mrb[22].mxu0 }
 0xe9b   :  { %v2094_v32 = vmul.f32 0.35355338, %v2090_v7  ;;  %v2824_v9 = vpop.f32.mrb[23].mxu0 }
 0xe9d   :  { %v2095_v13 = vadd.f32 %v2094_v32, %v3321_v26 }
 0xe9f   :  { %v2096_v8 = vsel %vm349_vm2, %v2095_v13, -inf }
 0xea0   :  { %2097 = vmax.xlane.f32.xlu0 %v2096_v8 }
 0xeb6   :  { %2107 = vrot.lane.b32.xlu0 %v3409_v23, %s3084_s28 }
 0xeba   :  { %2257 = vrot.lane.b32.xlu0 %v3395_v17, %s3085_s29 }
 0xf2d   :  { %v2098_v28 = vpop.xlane.xlu0 %2097 }
 0xf2e   :  { %v2099_v19 = vsub.f32 %v2095_v13, %v2098_v28 }
 0xf30   :  { %v2100_v21 = vmul.f32 1.442695, %v2099_v19 }
 0xf31   :  { %v2108_v10 = vpop.permute.xlu0 %2107 }
 0xf32   :  { %2924 = vpow2.f32 %v2100_v21  ;;  %2826 = vmatpush3.msra.mxu1 %v2108_v10 }
 0xf33   :  { %2835 = vmatprep.subr.mxu1 %v3082_v1 }
 0xf35   :  { %v2258_v17 = vpop.permute.xlu0 %2257 }
 0xf3c   :  { %v2925_v11 = vpop.eup %2924 }
 0xf3d   :  { %v2102_v26 = vsel %vm349_vm2, %v2925_v11, 0.0 }
 0xf3e   :  { %2103 = vadd.xlane.f32.xlu1 %v2102_v26 }
 0xf4f   :  { %2259 = vrot.lane.b32.xlu1 %v3392_v15, %s3085_s29 }
 0xfcb   :  { %v2104_v14 = vpop.xlane.xlu1 %2103 }
 0xfcc   :  { %2926 = vrcp.f32 %v2104_v14 }
 0xfcf   :  { %v2260_v16 = vpop.permute.xlu1 %2259 }
 0xfd6   :  { %v2927_v0 = vpop.eup %2926 }
 0xfd7   :  { %v2106_v12 = vmul.f32 %v2927_v0, %v2925_v11 }
 0xfd9   :  { %2504 = vst.msk [vmem:[#allocation11 + $0x30] sm:$0xff] %vm349_vm2, %v2106_v12  ;;  %2828 = vmatmul.mubr.msk.f32.vlgmr.msra.gmra.mrb[26].mxu1 %vm349_vm2, %v2106_v12 }
 0xfda   :  { %2836 = vmatpush3.xpose.msk.msra.mxu1 %vm349_vm2, %v2260_v16  ;;  %2837 = vmatprep.mubr.msk.f32.mxu1 %vm3081_vm0, %v3082_v1 }
 0xfdb   :  { %2845 = vmatprep.subr.mxu1 %v3082_v1 }
 0xfdd   :  { %2838 = vmatmul.mubr.msk.f32.vlgmr.msra.gmra.mrb[28].mxu1 %vm349_vm2, %v2258_v17 }
 0xfde   :  { %2846 = vmatpush3.msra.mxu1 %v3351_v59  ;;  %2847 = vmatprep.mubr.msk.f32.mxu1 %vm3081_vm0, %v3082_v1 }
0x10ac   :  { %v2179_v15 = vpop.f32.mrb[26].mxu1 }
0x10ad   :  { %v2829_v22 = vpop.f32.mrb[27].mxu1  ;;  %2833 = vmatmul.mubr.msk.f32.vlgmr.msra.gmra.mrb[24].mxu0 %vm349_vm2, %v2179_v15 }
0x10ae   :  { %2842 = vmatprep.mubr.msk.f32.mxu0 %vm3081_vm0, %v3082_v1 }
0x10b0   :  { %v2331_v18 = vpop.f32.mrb[28].mxu1 }
0x10b1   :  { %v2335_v20 = vmul.f32 0.35355338, %v2331_v18  ;;  %v2839_v24 = vpop.f32.mrb[29].mxu1 }
0x10b3   :  { %v2336_v30 = vadd.f32 %v2335_v20, %v3344_v49 }
0x10b5   :  { %v2337_v25 = vsel %vm349_vm2, %v2336_v30, -inf }
0x10b6   :  { %2338 = vmax.xlane.f32.xlu0 %v2337_v25 }
0x10cc   :  { %2348 = vrot.lane.b32.xlu0 %v3409_v23, %s3085_s29 }
0x1143   :  { %v2339_v59 = vpop.xlane.xlu0 %2338 }
0x1144   :  { %v2340_v27 = vsub.f32 %v2336_v30, %v2339_v59 }
0x1146   :  { %v2341_v29 = vmul.f32 1.442695, %v2340_v27 }
0x1147   :  { %v2349_v31 = vpop.permute.xlu0 %2348 }
0x1148   :  { %2928 = vpow2.f32 %v2341_v29  ;;  %2841 = vmatpush3.msra.mxu0 %v2349_v31 }
0x1152   :  { %v2929_v33 = vpop.eup %2928 }
0x1153   :  { %v2343_v1 = vsel %vm349_vm2, %v2929_v33, 0.0 }
0x1154   :  { %2344 = vadd.xlane.f32.xlu1 %v2343_v1 }
0x1180   :  { %v2252_v34 = vpop.f32.mrb[24].mxu0 }
0x1181   :  { %v2256_v35 = vadd.f32 %v2252_v34, %v2013_v3  ;;  %v2834_v61 = vpop.f32.mrb[25].mxu0 }
0x11e1   :  { %v2345_v49 = vpop.xlane.xlu1 %2344 }
0x11e2   :  { %2930 = vrcp.f32 %v2345_v49 }
0x11ec   :  { %v2931_v36 = vpop.eup %2930 }
0x11ed   :  { %v2347_v38 = vmul.f32 %v2931_v36, %v2929_v33 }
0x11ef   :  { %2505 = vst.msk [vmem:[#allocation11 + $0x38] sm:$0xff] %vm349_vm2, %v2347_v38  ;;  %2843 = vmatmul.mubr.msk.f32.vlgmr.msra.gmra.mrb[26].mxu0 %vm349_vm2, %v2347_v38 }
0x12c2   :  { %v2420_v23 = vpop.f32.mrb[26].mxu0 }
0x12c3   :  { %v2844_v39 = vpop.f32.mrb[27].mxu0  ;;  %2848 = vmatmul.mubr.msk.f32.vlgmr.msra.gmra.mrb[30].mxu1 %vm349_vm2, %v2420_v23 }
0x12c4   :  { %3031 = shalt.err (!%p3028_p8)
}
0x12c5   :  { %s3032_s12 = scalar_lea.hbm %s3525_s6, 1024 }
0x12c6   :  { %p3033_p9 = scmp.ne.s32.totalorder %s3525_s6, %s3032_s12  ;;  %p3036_p10 = scmp.lt.u32.totalorder %s3032_s12, %s3525_s6 }
0x12c8   :  { %p3038_p11 = pnand %p3036_p10, %p3033_p9 }
0x12ca   :  { %3041 = shalt.err (!%p3038_p11)
}
0x12cb   :  { %2529 = dma.vmem_to_hbm [thread:$0]  %s2524_s8, 1024, %s3525_s6, [#allocation12], %s3076_s9, %s3076_s9, %s3077_s10  }
0x12cc   :  { %s3087_s19 = smov [#allocation10]  }
0x12cd   :  { %s2511_s20 = sshll.u32 %s3087_s19, 4  ;;  %s2512_s20 = int_to_ptr.vmem [resolvable:$true] %s2511_s20 }
0x12ce   :  { %s3042_s2 = scalar_lea.vmem %s2512_s20, 256  ;;  %p3047_p13 = scmp.lt.s32.totalorder %s2512_s20, %s2512_s20 }
0x12cf   :  { %p3043_p12 = scmp.ne.s32.totalorder %s2512_s20, %s3042_s2  ;;  %p3048_p0 = scmp.lt.s32.totalorder %s3042_s2, %s3042_s2 }
0x12d1   :  { %p3049_p1 = por %p3048_p0, %p3047_p13 }
0x12d3   :  { %p3050_p2 = pnand %p3049_p1, %p3043_p12 }
0x1396   :  { %v2493_v40 = vpop.f32.mrb[30].mxu1 }
0x1397   :  { %v2497_v41 = vadd.f32 %v2493_v40, %v2256_v35  ;;  %v2849_v37 = vpop.f32.mrb[31].mxu1 }
0x1399   :  { %v2498_v42 = vadd.f32 %v3387_v5, %v2497_v41 }
0x139b   :  { %2500 = vst.msk [vmem:[#allocation10 + $0x8] sm:$0xff] %vm120_vm1, %v2498_v42 }
0x139c   :  { %3053 = shalt.err (!%p3050_p2)
}
0x139d   :  { %s3054_s6 = scalar_lea.hbm %s3524_s5, 256 }
0x139e   :  { %p3055_p3 = scmp.ne.s32.totalorder %s3524_s5, %s3054_s6  ;;  %p3058_p4 = scmp.lt.u32.totalorder %s3054_s6, %s3524_s5 }
0x13a0   :  { %p3060_p5 = pnand %p3058_p4, %p3055_p3 }
0x13a2   :  { %3063 = shalt.err (!%p3060_p5)
}
0x13a3   :  { %2517 = dma.vmem_to_hbm [thread:$0]  %s2512_s20, 256, %s3524_s5, [#allocation4], %s3076_s9, %s3076_s9, %s3077_s10  }
0x13a4   :  { %3070 = dma.done.wait [#allocation4], 256  }
0x13a5   :  { %3071 = vsyncadd [#allocation4], 4294967040 }
0x13a6   :  { %3072 = dma.done.wait [#allocation12], 1024  }
0x13a7   :  { %3073 = vsyncadd [#allocation12], 4294966272 }
0x13a8   :  { %2536 = vsyncpa [#allocation3], 1 }
0x13a9   :  { %2537 = vsyncpa [#allocation6], 1 }
0x13aa   :  { %2538 = vsyncpa [#allocation9], 1 }
0x13ab   :  { %2539 = vsyncpa [#allocation4], 1 }
0x13ac   :  { %2540 = vsyncpa [#allocation12], 1 }

</bundles_post_ra>
